<compile_context>
chip_gen: v6e
topology: v6e:2x2x1
jax: 0.10.0
libtpu: 0.0.40
codegen_flags: <defaults>
</compile_context>

<pallas_src>
import jax
import jax.numpy as jnp
from jax.experimental import pallas as pl
from jax.experimental.pallas import tpu as pltpu


# ----------------------------------------------------------------------------- kernel body

def _make_fused_mlp_kernel(n_layers, softplus_flags, compute_dtype):
    """Kernel running a full stack of Linear(+softplus) layers on one batch tile.

    refs = (x_ref, w1_ref, b1_ref, ..., wN_ref, bN_ref, o_ref)
    """

    def kernel(*refs):
        x_ref, o_ref = refs[0], refs[-1]
        wb = refs[1:-1]

        h = x_ref[...].astype(compute_dtype)
        for li in range(n_layers):
            w = wb[2 * li][...]          # (K_i, N_i) in compute_dtype (bf16)
            b = wb[2 * li + 1][...]      # (1, N_i) in f32
            # MXU matmul with f32 accumulation; bias add in f32 on the VPU.
            y = jnp.dot(h, w, preferred_element_type=jnp.float32) + b
            if softplus_flags[li]:
                # numerically stable softplus: max(y,0) + log1p(exp(-|y|))  (exp/log1p -> EUP)
                y = jnp.maximum(y, 0.0) + jnp.log1p(jnp.exp(-jnp.abs(y)))
            # Activations between layers travel in the compute dtype (matches MXU input width).
            h = y.astype(compute_dtype) if li + 1 < n_layers else y
        o_ref[...] = h.astype(o_ref.dtype)

    return kernel


# ----------------------------------------------------------------------------- tiling / VMEM

def _select_tile_and_vmem(K0, NL, max_hidden, layers, x_itemsize, out_itemsize):
    """Generation-aware batch tile + vmem limit derived from the actual shapes."""
    try:
        vmem_cap = int(pltpu.get_tpu_info().vmem_capacity_bytes)
    except Exception:
        vmem_cap = 64 * 1024 * 1024          # conservative fallback: v7x per-TC VMEM
    budget = int(vmem_cap * 0.80)            # leave headroom for compiler-internal scratch

    # Resident weight/bias blocks.  Count 2 buffers (worst case: the Buffered(1) fallback).
    weight_bytes = 2 * sum(int(w.size) * w.dtype.itemsize + int(b.size) * b.dtype.itemsize
                           for (w, b) in layers)

    # Per-batch-row streamed / temporary bytes.
    per_row = (2 * K0 * x_itemsize           # x block, double buffered
               + 2 * NL * out_itemsize       # out block, double buffered
               + 4 * NL                      # f32 final activation before cast/store
               + 8 * max_hidden)             # f32 intermediate activations (~2 live)

    fixed = weight_bytes + (4 << 20)
    tm = 8
    for cand in (512, 256, 128, 64, 32, 16, 8):
        if fixed + cand * per_row <= budget:
            tm = cand
            break
    vmem_limit = int(min(budget, max(fixed + tm * per_row + (8 << 20), 32 << 20)))
    return tm, vmem_limit


# ----------------------------------------------------------------------------- pallas_call wrapper

_WEIGHT_SINGLE_BUFFER_OK = True   # flips to False if pipeline_mode=pl.Buffered(1) is unsupported


def _const_block_spec(shape, single_buffer):
    """Full-array block with a constant index_map (weight resident across batch tiles)."""
    idx = lambda i: (0,) * len(shape)
    if single_buffer:
        # Never-changing blocks don't need double buffering; halves their VMEM footprint.
        return pl.BlockSpec(shape, idx, pipeline_mode=pl.Buffered(1))
    return pl.BlockSpec(shape, idx)


def fused_mlp(x, layers, softplus_flags, *, out_dtype=jnp.bfloat16):
    """Run a stack of Linear(+softplus) layers as a single Pallas TPU kernel.

    x:       (M, K) array (any float dtype; streamed as-is)
    layers:  list of (w (K_i, N_i) bf16, b (1, N_i) f32)
    softplus_flags: list of bools, one per layer
    """
    global _WEIGHT_SINGLE_BUFFER_OK

    M, K = x.shape
    n_layers = len(layers)
    assert n_layers == len(softplus_flags) and n_layers >= 1
    assert layers[0][0].shape[0] == K, "input feature dim mismatch"

    NL = layers[-1][0].shape[1]
    compute_dtype = layers[0][0].dtype
    max_hidden = max(w.shape[1] for (w, _) in layers)

    tm, vmem_limit = _select_tile_and_vmem(
        K, NL, max_hidden, layers,
        x_itemsize=x.dtype.itemsize,
        out_itemsize=jnp.dtype(out_dtype).itemsize)
    # Small batches: a single full-dim block (exempt from the sublane-divisibility rule).
    # Large batches: tm rows per tile, cdiv grid (>= 2 parallel tiles -> both v7x TCs busy);
    # the boundary tile is handled by Pallas' clamped DMAs (no pad / no slice copies).
    tm = M if M <= tm else tm
    grid_m = pl.cdiv(M, tm)

    kernel = _make_fused_mlp_kernel(
        n_layers, tuple(bool(f) for f in softplus_flags), compute_dtype)
    flat_wb = [a for wb in layers for a in wb]

    def run(single_buffer):
        in_specs = [pl.BlockSpec((tm, K), lambda i: (i, 0))]
        for (w, b) in layers:
            in_specs.append(_const_block_spec(w.shape, single_buffer))
            in_specs.append(_const_block_spec(b.shape, single_buffer))
        return pl.pallas_call(
            kernel,
            out_shape=jax.ShapeDtypeStruct((M, NL), out_dtype),
            grid_spec=pltpu.PrefetchScalarGridSpec(
                num_scalar_prefetch=0,
                grid=(grid_m,),
                in_specs=in_specs,
                out_specs=pl.BlockSpec((tm, NL), lambda i: (i, 0)),
            ),
            compiler_params=pltpu.CompilerParams(
                dimension_semantics=("parallel",),
                vmem_limit_bytes=vmem_limit,
            ),
        )(x, *flat_wb)

    if _WEIGHT_SINGLE_BUFFER_OK:
        try:
            return run(True)
        except Exception:
            _WEIGHT_SINGLE_BUFFER_OK = False   # older JAX: fall back to default buffering
    return run(False)


# ----------------------------------------------------------------------------- model

class PallasAutoencoder:
    """Mirrors the PyTorch Autoencoder(space_dim, hidden_units, n_z) forward pass."""

    def __init__(self, space_dim, hidden_units, n_z, key, *,
                 weight_dtype=jnp.bfloat16, out_dtype=jnp.bfloat16):
        self.out_dtype = out_dtype
        enc_dims = [space_dim] + list(hidden_units) + [n_z]
        dec_dims = [n_z] + list(hidden_units[::-1]) + [space_dim]

        def make_linear(k, fan_in, fan_out):
            # torch.nn.Linear init: U(-1/sqrt(fan_in), 1/sqrt(fan_in)); w stored as (in, out).
            kw, kb = jax.random.split(k)
            bound = 1.0 / jnp.sqrt(jnp.float32(fan_in))
            w = jax.random.uniform(kw, (fan_in, fan_out), jnp.float32, -bound, bound)
            b = jax.random.uniform(kb, (1, fan_out), jnp.float32, -bound, bound)
            # Weights cast ONCE to the compute dtype (bf16): halves resident VMEM and the
            # weight HBM stream.  Biases stay f32 (added to the f32 accumulator).
            return (w.astype(weight_dtype), b)

        keys = jax.random.split(key, len(enc_dims) - 1 + len(dec_dims) - 1)
        ki = iter(keys)
        self.enc_layers = [make_linear(next(ki), enc_dims[i], enc_dims[i + 1])
                           for i in range(len(enc_dims) - 1)]
        self.dec_layers = [make_linear(next(ki), dec_dims[i], dec_dims[i + 1])
                           for i in range(len(dec_dims) - 1)]

        self.enc_flags = [True] * (len(self.enc_layers) - 1) + [False]   # no softplus on latent
        self.dec_flags = [True] * (len(self.dec_layers) - 1) + [False]   # no softplus on output

    def encoder(self, x):
        return fused_mlp(x, self.enc_layers, self.enc_flags, out_dtype=self.out_dtype)

    def decoder(self, z):
        return fused_mlp(z, self.dec_layers, self.dec_flags, out_dtype=self.out_dtype)

    def forward(self, x):
        # Fully fused: one pallas_call for the whole autoencoder — weights loaded into VMEM
        # once per grid, intermediate activations (incl. the latent) never touch HBM.
        return fused_mlp(x, self.enc_layers + self.dec_layers,
                         self.enc_flags + self.dec_flags, out_dtype=self.out_dtype)


# ----------------------------------------------------------------------------- reference

def _reference_forward(model, x):
    """Pure-JAX reference mirroring the kernel's dtype choices (bf16 dots, f32 accumulation)."""
    layers = model.enc_layers + model.dec_layers
    flags = model.enc_flags + model.dec_flags
    h = x
    for (w, b), act in zip(layers, flags):
        y = jnp.dot(h.astype(w.dtype), w, preferred_element_type=jnp.float32) + b
        if act:
            y = jnp.maximum(y, 0.0) + jnp.log1p(jnp.exp(-jnp.abs(y)))
        h = y
    return h


# ----------------------------------------------------------------------------- test

if __name__ == "__main__":
    # Small, self-consistent shapes (the real model uses space_dim=10100; hidden_units / n_z
    # come from the checkpoint — here chosen small and synthetic).
    batch = 4
    space_dim = 256
    hidden_units = [128, 64]
    n_z = 16

    key = jax.random.PRNGKey(0)
    k_model, k_x = jax.random.split(key)

    model = PallasAutoencoder(space_dim, hidden_units, n_z, k_model)
    x = jax.random.normal(k_x, (batch, space_dim), jnp.float32)

    # Fully fused forward (single pallas_call).
    y = jax.block_until_ready(model.forward(x))
    # Two-call path (encoder kernel then decoder kernel), matching the module's methods.
    y2 = jax.block_until_ready(model.decoder(model.encoder(x)))

    y_ref = jax.block_until_ready(_reference_forward(model, x))

    assert y.shape == (batch, space_dim)
    assert y2.shape == (batch, space_dim)
    # Output is streamed in bf16 -> compare in f32 with bf16-scale tolerances.
    assert jnp.allclose(y.astype(jnp.float32), y_ref.astype(jnp.float32),
                        atol=1e-2, rtol=2e-2), "fused forward mismatch vs reference"
    assert jnp.allclose(y2.astype(jnp.float32), y_ref.astype(jnp.float32),
                        atol=1e-2, rtol=2e-2), "encoder/decoder mismatch vs reference"

    print("KERNEL_OK")
</pallas_src>

<mosaic_0001>
module attributes {stable_mosaic.version = 11 : i64} {
  func.func @kernel(%arg0: i32, %arg1: memref<4x256xf32, #tpu.memory_space<vmem>>, %arg2: memref<256x128xbf16, #tpu.memory_space<vmem>>, %arg3: memref<1x128xf32, #tpu.memory_space<vmem>>, %arg4: memref<128x64xbf16, #tpu.memory_space<vmem>>, %arg5: memref<1x64xf32, #tpu.memory_space<vmem>>, %arg6: memref<64x16xbf16, #tpu.memory_space<vmem>>, %arg7: memref<1x16xf32, #tpu.memory_space<vmem>>, %arg8: memref<16x64xbf16, #tpu.memory_space<vmem>>, %arg9: memref<1x64xf32, #tpu.memory_space<vmem>>, %arg10: memref<64x128xbf16, #tpu.memory_space<vmem>>, %arg11: memref<1x128xf32, #tpu.memory_space<vmem>>, %arg12: memref<128x256xbf16, #tpu.memory_space<vmem>>, %arg13: memref<1x256xf32, #tpu.memory_space<vmem>>, %arg14: memref<4x256xbf16, #tpu.memory_space<vmem>>) attributes {dimension_semantics = [#tpu.dimension_semantics<parallel>], iteration_bounds = array<i64: 1>, scalar_prefetch = 0 : i64, scratch_operands = 0 : i64, tpu.core_type = #tpu.core_type<tc>, window_params = [{transform_indices = @transform_0, window_bounds = array<i64: 4, 256>}, {pipeline_mode = #tpu.pipeline_mode<synchronous>, transform_indices = @transform_1, window_bounds = array<i64: 256, 128>}, {pipeline_mode = #tpu.pipeline_mode<synchronous>, transform_indices = @transform_2, window_bounds = array<i64: 1, 128>}, {pipeline_mode = #tpu.pipeline_mode<synchronous>, transform_indices = @transform_3, window_bounds = array<i64: 128, 64>}, {pipeline_mode = #tpu.pipeline_mode<synchronous>, transform_indices = @transform_4, window_bounds = array<i64: 1, 64>}, {pipeline_mode = #tpu.pipeline_mode<synchronous>, transform_indices = @transform_5, window_bounds = array<i64: 64, 16>}, {pipeline_mode = #tpu.pipeline_mode<synchronous>, transform_indices = @transform_6, window_bounds = array<i64: 1, 16>}, {pipeline_mode = #tpu.pipeline_mode<synchronous>, transform_indices = @transform_7, window_bounds = array<i64: 16, 64>}, {pipeline_mode = #tpu.pipeline_mode<synchronous>, transform_indices = @transform_8, window_bounds = array<i64: 1, 64>}, {pipeline_mode = #tpu.pipeline_mode<synchronous>, transform_indices = @transform_9, window_bounds = array<i64: 64, 128>}, {pipeline_mode = #tpu.pipeline_mode<synchronous>, transform_indices = @transform_10, window_bounds = array<i64: 1, 128>}, {pipeline_mode = #tpu.pipeline_mode<synchronous>, transform_indices = @transform_11, window_bounds = array<i64: 128, 256>}, {pipeline_mode = #tpu.pipeline_mode<synchronous>, transform_indices = @transform_12, window_bounds = array<i64: 1, 256>}, {transform_indices = @transform_13, window_bounds = array<i64: 4, 256>}]} {
    %c0 = arith.constant 0 : index
    %c0_0 = arith.constant 0 : index
    %0 = vector.load %arg1[%c0, %c0_0] : memref<4x256xf32, #tpu.memory_space<vmem>>, vector<4x256xf32>
    %1 = arith.truncf %0 : vector<4x256xf32> to vector<4x256xbf16>
    %c0_1 = arith.constant 0 : index
    %c0_2 = arith.constant 0 : index
    %2 = vector.load %arg2[%c0_1, %c0_2] : memref<256x128xbf16, #tpu.memory_space<vmem>>, vector<256x128xbf16>
    %c0_3 = arith.constant 0 : index
    %c0_4 = arith.constant 0 : index
    %3 = vector.load %arg3[%c0_3, %c0_4] : memref<1x128xf32, #tpu.memory_space<vmem>>, vector<1x128xf32>
    %cst = arith.constant dense<0.000000e+00> : vector<4x128xf32>
    %4 = tpu.matmul %1, %2, %cst {dimension_numbers = #tpu.dot_dimension_numbers<[1], [0], [0], [1], [0, 0, 1, 1], [], []>} : vector<4x256xbf16>, vector<256x128xbf16>, vector<4x128xf32> -> vector<4x128xf32>
    %5 = vector.broadcast %3 : vector<1x128xf32> to vector<4x128xf32>
    %6 = arith.addf %4, %5 : vector<4x128xf32>
    %cst_5 = arith.constant 0.000000e+00 : f32
    %7 = vector.broadcast %cst_5 : f32 to vector<4x128xf32>
    %8 = arith.maximumf %6, %7 : vector<4x128xf32>
    %9 = math.absf %6 : vector<4x128xf32>
    %cst_6 = arith.constant 0.000000e+00 : f32
    %10 = vector.broadcast %cst_6 : f32 to vector<4x128xf32>
    %11 = arith.subf %10, %9 : vector<4x128xf32>
    %12 = math.exp %11 : vector<4x128xf32>
    %13 = math.log1p %12 : vector<4x128xf32>
    %14 = arith.addf %8, %13 : vector<4x128xf32>
    %15 = arith.truncf %14 : vector<4x128xf32> to vector<4x128xbf16>
    %c0_7 = arith.constant 0 : index
    %c0_8 = arith.constant 0 : index
    %16 = vector.load %arg4[%c0_7, %c0_8] : memref<128x64xbf16, #tpu.memory_space<vmem>>, vector<128x64xbf16>
    %c0_9 = arith.constant 0 : index
    %c0_10 = arith.constant 0 : index
    %17 = vector.load %arg5[%c0_9, %c0_10] : memref<1x64xf32, #tpu.memory_space<vmem>>, vector<1x64xf32>
    %cst_11 = arith.constant dense<0.000000e+00> : vector<4x64xf32>
    %18 = tpu.matmul %15, %16, %cst_11 {dimension_numbers = #tpu.dot_dimension_numbers<[1], [0], [0], [1], [0, 0, 1, 1], [], []>} : vector<4x128xbf16>, vector<128x64xbf16>, vector<4x64xf32> -> vector<4x64xf32>
    %19 = vector.broadcast %17 : vector<1x64xf32> to vector<4x64xf32>
    %20 = arith.addf %18, %19 : vector<4x64xf32>
    %cst_12 = arith.constant 0.000000e+00 : f32
    %21 = vector.broadcast %cst_12 : f32 to vector<4x64xf32>
    %22 = arith.maximumf %20, %21 : vector<4x64xf32>
    %23 = math.absf %20 : vector<4x64xf32>
    %cst_13 = arith.constant 0.000000e+00 : f32
    %24 = vector.broadcast %cst_13 : f32 to vector<4x64xf32>
    %25 = arith.subf %24, %23 : vector<4x64xf32>
    %26 = math.exp %25 : vector<4x64xf32>
    %27 = math.log1p %26 : vector<4x64xf32>
    %28 = arith.addf %22, %27 : vector<4x64xf32>
    %29 = arith.truncf %28 : vector<4x64xf32> to vector<4x64xbf16>
    %c0_14 = arith.constant 0 : index
    %c0_15 = arith.constant 0 : index
    %30 = vector.load %arg6[%c0_14, %c0_15] : memref<64x16xbf16, #tpu.memory_space<vmem>>, vector<64x16xbf16>
    %c0_16 = arith.constant 0 : index
    %c0_17 = arith.constant 0 : index
    %31 = vector.load %arg7[%c0_16, %c0_17] : memref<1x16xf32, #tpu.memory_space<vmem>>, vector<1x16xf32>
    %cst_18 = arith.constant dense<0.000000e+00> : vector<4x16xf32>
    %32 = tpu.matmul %29, %30, %cst_18 {dimension_numbers = #tpu.dot_dimension_numbers<[1], [0], [0], [1], [0, 0, 1, 1], [], []>} : vector<4x64xbf16>, vector<64x16xbf16>, vector<4x16xf32> -> vector<4x16xf32>
    %33 = vector.broadcast %31 : vector<1x16xf32> to vector<4x16xf32>
    %34 = arith.addf %32, %33 : vector<4x16xf32>
    %35 = arith.truncf %34 : vector<4x16xf32> to vector<4x16xbf16>
    %c0_19 = arith.constant 0 : index
    %c0_20 = arith.constant 0 : index
    %36 = vector.load %arg8[%c0_19, %c0_20] : memref<16x64xbf16, #tpu.memory_space<vmem>>, vector<16x64xbf16>
    %c0_21 = arith.constant 0 : index
    %c0_22 = arith.constant 0 : index
    %37 = vector.load %arg9[%c0_21, %c0_22] : memref<1x64xf32, #tpu.memory_space<vmem>>, vector<1x64xf32>
    %cst_23 = arith.constant dense<0.000000e+00> : vector<4x64xf32>
    %38 = tpu.matmul %35, %36, %cst_23 {dimension_numbers = #tpu.dot_dimension_numbers<[1], [0], [0], [1], [0, 0, 1, 1], [], []>} : vector<4x16xbf16>, vector<16x64xbf16>, vector<4x64xf32> -> vector<4x64xf32>
    %39 = vector.broadcast %37 : vector<1x64xf32> to vector<4x64xf32>
    %40 = arith.addf %38, %39 : vector<4x64xf32>
    %cst_24 = arith.constant 0.000000e+00 : f32
    %41 = vector.broadcast %cst_24 : f32 to vector<4x64xf32>
    %42 = arith.maximumf %40, %41 : vector<4x64xf32>
    %43 = math.absf %40 : vector<4x64xf32>
    %cst_25 = arith.constant 0.000000e+00 : f32
    %44 = vector.broadcast %cst_25 : f32 to vector<4x64xf32>
    %45 = arith.subf %44, %43 : vector<4x64xf32>
    %46 = math.exp %45 : vector<4x64xf32>
    %47 = math.log1p %46 : vector<4x64xf32>
    %48 = arith.addf %42, %47 : vector<4x64xf32>
    %49 = arith.truncf %48 : vector<4x64xf32> to vector<4x64xbf16>
    %c0_26 = arith.constant 0 : index
    %c0_27 = arith.constant 0 : index
    %50 = vector.load %arg10[%c0_26, %c0_27] : memref<64x128xbf16, #tpu.memory_space<vmem>>, vector<64x128xbf16>
    %c0_28 = arith.constant 0 : index
    %c0_29 = arith.constant 0 : index
    %51 = vector.load %arg11[%c0_28, %c0_29] : memref<1x128xf32, #tpu.memory_space<vmem>>, vector<1x128xf32>
    %cst_30 = arith.constant dense<0.000000e+00> : vector<4x128xf32>
    %52 = tpu.matmul %49, %50, %cst_30 {dimension_numbers = #tpu.dot_dimension_numbers<[1], [0], [0], [1], [0, 0, 1, 1], [], []>} : vector<4x64xbf16>, vector<64x128xbf16>, vector<4x128xf32> -> vector<4x128xf32>
    %53 = vector.broadcast %51 : vector<1x128xf32> to vector<4x128xf32>
    %54 = arith.addf %52, %53 : vector<4x128xf32>
    %cst_31 = arith.constant 0.000000e+00 : f32
    %55 = vector.broadcast %cst_31 : f32 to vector<4x128xf32>
    %56 = arith.maximumf %54, %55 : vector<4x128xf32>
    %57 = math.absf %54 : vector<4x128xf32>
    %cst_32 = arith.constant 0.000000e+00 : f32
    %58 = vector.broadcast %cst_32 : f32 to vector<4x128xf32>
    %59 = arith.subf %58, %57 : vector<4x128xf32>
    %60 = math.exp %59 : vector<4x128xf32>
    %61 = math.log1p %60 : vector<4x128xf32>
    %62 = arith.addf %56, %61 : vector<4x128xf32>
    %63 = arith.truncf %62 : vector<4x128xf32> to vector<4x128xbf16>
    %c0_33 = arith.constant 0 : index
    %c0_34 = arith.constant 0 : index
    %64 = vector.load %arg12[%c0_33, %c0_34] : memref<128x256xbf16, #tpu.memory_space<vmem>>, vector<128x256xbf16>
    %c0_35 = arith.constant 0 : index
    %c0_36 = arith.constant 0 : index
    %65 = vector.load %arg13[%c0_35, %c0_36] : memref<1x256xf32, #tpu.memory_space<vmem>>, vector<1x256xf32>
    %cst_37 = arith.constant dense<0.000000e+00> : vector<4x256xf32>
    %66 = tpu.matmul %63, %64, %cst_37 {dimension_numbers = #tpu.dot_dimension_numbers<[1], [0], [0], [1], [0, 0, 1, 1], [], []>} : vector<4x128xbf16>, vector<128x256xbf16>, vector<4x256xf32> -> vector<4x256xf32>
    %67 = vector.broadcast %65 : vector<1x256xf32> to vector<4x256xf32>
    %68 = arith.addf %66, %67 : vector<4x256xf32>
    %69 = arith.truncf %68 : vector<4x256xf32> to vector<4x256xbf16>
    %c0_38 = arith.constant 0 : index
    %c0_39 = arith.constant 0 : index
    %70 = vector.load %arg14[%c0_38, %c0_39] : memref<4x256xbf16, #tpu.memory_space<vmem>>, vector<4x256xbf16>
    tpu.vector_store %arg14[%c0_38, %c0_39], %69 {strides = array<i32>} : memref<4x256xbf16, #tpu.memory_space<vmem>>, vector<4x256xbf16>,
    return
  }
  func.func @transform_0(%arg0: i32) -> (i32, i32) {
    %c0_i32 = arith.constant 0 : i32
    %c0_i32_0 = arith.constant 0 : i32
    return %arg0, %c0_i32 : i32, i32
  }
  func.func @transform_1(%arg0: i32) -> (i32, i32) {
    %c0_i32 = arith.constant 0 : i32
    %c0_i32_0 = arith.constant 0 : i32
    %c0_i32_1 = arith.constant 0 : i32
    return %c0_i32, %c0_i32_0 : i32, i32
  }
  func.func @transform_2(%arg0: i32) -> (i32, i32) {
    %c0_i32 = arith.constant 0 : i32
    %c0_i32_0 = arith.constant 0 : i32
    %c0_i32_1 = arith.constant 0 : i32
    return %c0_i32, %c0_i32_0 : i32, i32
  }
  func.func @transform_3(%arg0: i32) -> (i32, i32) {
    %c0_i32 = arith.constant 0 : i32
    %c0_i32_0 = arith.constant 0 : i32
    %c0_i32_1 = arith.constant 0 : i32
    return %c0_i32, %c0_i32_0 : i32, i32
  }
  func.func @transform_4(%arg0: i32) -> (i32, i32) {
    %c0_i32 = arith.constant 0 : i32
    %c0_i32_0 = arith.constant 0 : i32
    %c0_i32_1 = arith.constant 0 : i32
    return %c0_i32, %c0_i32_0 : i32, i32
  }
  func.func @transform_5(%arg0: i32) -> (i32, i32) {
    %c0_i32 = arith.constant 0 : i32
    %c0_i32_0 = arith.constant 0 : i32
    %c0_i32_1 = arith.constant 0 : i32
    return %c0_i32, %c0_i32_0 : i32, i32
  }
  func.func @transform_6(%arg0: i32) -> (i32, i32) {
    %c0_i32 = arith.constant 0 : i32
    %c0_i32_0 = arith.constant 0 : i32
    %c0_i32_1 = arith.constant 0 : i32
    return %c0_i32, %c0_i32_0 : i32, i32
  }
  func.func @transform_7(%arg0: i32) -> (i32, i32) {
    %c0_i32 = arith.constant 0 : i32
    %c0_i32_0 = arith.constant 0 : i32
    %c0_i32_1 = arith.constant 0 : i32
    return %c0_i32, %c0_i32_0 : i32, i32
  }
  func.func @transform_8(%arg0: i32) -> (i32, i32) {
    %c0_i32 = arith.constant 0 : i32
    %c0_i32_0 = arith.constant 0 : i32
    %c0_i32_1 = arith.constant 0 : i32
    return %c0_i32, %c0_i32_0 : i32, i32
  }
  func.func @transform_9(%arg0: i32) -> (i32, i32) {
    %c0_i32 = arith.constant 0 : i32
    %c0_i32_0 = arith.constant 0 : i32
    %c0_i32_1 = arith.constant 0 : i32
    return %c0_i32, %c0_i32_0 : i32, i32
  }
  func.func @transform_10(%arg0: i32) -> (i32, i32) {
    %c0_i32 = arith.constant 0 : i32
    %c0_i32_0 = arith.constant 0 : i32
    %c0_i32_1 = arith.constant 0 : i32
    return %c0_i32, %c0_i32_0 : i32, i32
  }
  func.func @transform_11(%arg0: i32) -> (i32, i32) {
    %c0_i32 = arith.constant 0 : i32
    %c0_i32_0 = arith.constant 0 : i32
    %c0_i32_1 = arith.constant 0 : i32
    return %c0_i32, %c0_i32_0 : i32, i32
  }
  func.func @transform_12(%arg0: i32) -> (i32, i32) {
    %c0_i32 = arith.constant 0 : i32
    %c0_i32_0 = arith.constant 0 : i32
    %c0_i32_1 = arith.constant 0 : i32
    return %c0_i32, %c0_i32_0 : i32, i32
  }
  func.func @transform_13(%arg0: i32) -> (i32, i32) {
    %c0_i32 = arith.constant 0 : i32
    %c0_i32_0 = arith.constant 0 : i32
    return %arg0, %c0_i32 : i32, i32
  }
}

module attributes {stable_mosaic.version = 11 : i64} {
  func.func @kernel(%arg0: i32, %arg1: memref<4x256xf32, #tpu.memory_space<vmem>>, %arg2: memref<256x128xbf16, #tpu.memory_space<vmem>>, %arg3: memref<1x128xf32, #tpu.memory_space<vmem>>, %arg4: memref<128x64xbf16, #tpu.memory_space<vmem>>, %arg5: memref<1x64xf32, #tpu.memory_space<vmem>>, %arg6: memref<64x16xbf16, #tpu.memory_space<vmem>>, %arg7: memref<1x16xf32, #tpu.memory_space<vmem>>, %arg8: memref<16x64xbf16, #tpu.memory_space<vmem>>, %arg9: memref<1x64xf32, #tpu.memory_space<vmem>>, %arg10: memref<64x128xbf16, #tpu.memory_space<vmem>>, %arg11: memref<1x128xf32, #tpu.memory_space<vmem>>, %arg12: memref<128x256xbf16, #tpu.memory_space<vmem>>, %arg13: memref<1x256xf32, #tpu.memory_space<vmem>>, %arg14: memref<4x256xbf16, #tpu.memory_space<vmem>>) attributes {dimension_semantics = [#tpu.dimension_semantics<parallel>], iteration_bounds = array<i64: 1>, scalar_prefetch = 0 : i64, scratch_operands = 0 : i64, tpu.core_type = #tpu.core_type<tc>, window_params = [{transform_indices = @transform_0, window_bounds = array<i64: 4, 256>}, {pipeline_mode = #tpu.pipeline_mode<synchronous>, transform_indices = @transform_1, window_bounds = array<i64: 256, 128>}, {pipeline_mode = #tpu.pipeline_mode<synchronous>, transform_indices = @transform_2, window_bounds = array<i64: 1, 128>}, {pipeline_mode = #tpu.pipeline_mode<synchronous>, transform_indices = @transform_3, window_bounds = array<i64: 128, 64>}, {pipeline_mode = #tpu.pipeline_mode<synchronous>, transform_indices = @transform_4, window_bounds = array<i64: 1, 64>}, {pipeline_mode = #tpu.pipeline_mode<synchronous>, transform_indices = @transform_5, window_bounds = array<i64: 64, 16>}, {pipeline_mode = #tpu.pipeline_mode<synchronous>, transform_indices = @transform_6, window_bounds = array<i64: 1, 16>}, {pipeline_mode = #tpu.pipeline_mode<synchronous>, transform_indices = @transform_7, window_bounds = array<i64: 16, 64>}, {pipeline_mode = #tpu.pipeline_mode<synchronous>, transform_indices = @transform_8, window_bounds = array<i64: 1, 64>}, {pipeline_mode = #tpu.pipeline_mode<synchronous>, transform_indices = @transform_9, window_bounds = array<i64: 64, 128>}, {pipeline_mode = #tpu.pipeline_mode<synchronous>, transform_indices = @transform_10, window_bounds = array<i64: 1, 128>}, {pipeline_mode = #tpu.pipeline_mode<synchronous>, transform_indices = @transform_11, window_bounds = array<i64: 128, 256>}, {pipeline_mode = #tpu.pipeline_mode<synchronous>, transform_indices = @transform_12, window_bounds = array<i64: 1, 256>}, {transform_indices = @transform_13, window_bounds = array<i64: 4, 256>}]} {
    %c0 = arith.constant 0 : index
    %c0_0 = arith.constant 0 : index
    %0 = vector.load %arg1[%c0, %c0_0] : memref<4x256xf32, #tpu.memory_space<vmem>>, vector<4x256xf32>
    %1 = arith.truncf %0 : vector<4x256xf32> to vector<4x256xbf16>
    %c0_1 = arith.constant 0 : index
    %c0_2 = arith.constant 0 : index
    %2 = vector.load %arg2[%c0_1, %c0_2] : memref<256x128xbf16, #tpu.memory_space<vmem>>, vector<256x128xbf16>
    %c0_3 = arith.constant 0 : index
    %c0_4 = arith.constant 0 : index
    %3 = vector.load %arg3[%c0_3, %c0_4] : memref<1x128xf32, #tpu.memory_space<vmem>>, vector<1x128xf32>
    %cst = arith.constant dense<0.000000e+00> : vector<4x128xf32>
    %4 = tpu.matmul %1, %2, %cst {dimension_numbers = #tpu.dot_dimension_numbers<[1], [0], [0], [1], [0, 0, 1, 1], [], []>} : vector<4x256xbf16>, vector<256x128xbf16>, vector<4x128xf32> -> vector<4x128xf32>
    %5 = vector.broadcast %3 : vector<1x128xf32> to vector<4x128xf32>
    %6 = arith.addf %4, %5 : vector<4x128xf32>
    %cst_5 = arith.constant 0.000000e+00 : f32
    %7 = vector.broadcast %cst_5 : f32 to vector<4x128xf32>
    %8 = arith.maximumf %6, %7 : vector<4x128xf32>
    %9 = math.absf %6 : vector<4x128xf32>
    %cst_6 = arith.constant 0.000000e+00 : f32
    %10 = vector.broadcast %cst_6 : f32 to vector<4x128xf32>
    %11 = arith.subf %10, %9 : vector<4x128xf32>
    %12 = math.exp %11 : vector<4x128xf32>
    %13 = math.log1p %12 : vector<4x128xf32>
    %14 = arith.addf %8, %13 : vector<4x128xf32>
    %15 = arith.truncf %14 : vector<4x128xf32> to vector<4x128xbf16>
    %c0_7 = arith.constant 0 : index
    %c0_8 = arith.constant 0 : index
    %16 = vector.load %arg4[%c0_7, %c0_8] : memref<128x64xbf16, #tpu.memory_space<vmem>>, vector<128x64xbf16>
    %c0_9 = arith.constant 0 : index
    %c0_10 = arith.constant 0 : index
    %17 = vector.load %arg5[%c0_9, %c0_10] : memref<1x64xf32, #tpu.memory_space<vmem>>, vector<1x64xf32>
    %cst_11 = arith.constant dense<0.000000e+00> : vector<4x64xf32>
    %18 = tpu.matmul %15, %16, %cst_11 {dimension_numbers = #tpu.dot_dimension_numbers<[1], [0], [0], [1], [0, 0, 1, 1], [], []>} : vector<4x128xbf16>, vector<128x64xbf16>, vector<4x64xf32> -> vector<4x64xf32>
    %19 = vector.broadcast %17 : vector<1x64xf32> to vector<4x64xf32>
    %20 = arith.addf %18, %19 : vector<4x64xf32>
    %cst_12 = arith.constant 0.000000e+00 : f32
    %21 = vector.broadcast %cst_12 : f32 to vector<4x64xf32>
    %22 = arith.maximumf %20, %21 : vector<4x64xf32>
    %23 = math.absf %20 : vector<4x64xf32>
    %cst_13 = arith.constant 0.000000e+00 : f32
    %24 = vector.broadcast %cst_13 : f32 to vector<4x64xf32>
    %25 = arith.subf %24, %23 : vector<4x64xf32>
    %26 = math.exp %25 : vector<4x64xf32>
    %27 = math.log1p %26 : vector<4x64xf32>
    %28 = arith.addf %22, %27 : vector<4x64xf32>
    %29 = arith.truncf %28 : vector<4x64xf32> to vector<4x64xbf16>
    %c0_14 = arith.constant 0 : index
    %c0_15 = arith.constant 0 : index
    %30 = vector.load %arg6[%c0_14, %c0_15] : memref<64x16xbf16, #tpu.memory_space<vmem>>, vector<64x16xbf16>
    %c0_16 = arith.constant 0 : index
    %c0_17 = arith.constant 0 : index
    %31 = vector.load %arg7[%c0_16, %c0_17] : memref<1x16xf32, #tpu.memory_space<vmem>>, vector<1x16xf32>
    %cst_18 = arith.constant dense<0.000000e+00> : vector<4x16xf32>
    %32 = tpu.matmul %29, %30, %cst_18 {dimension_numbers = #tpu.dot_dimension_numbers<[1], [0], [0], [1], [0, 0, 1, 1], [], []>} : vector<4x64xbf16>, vector<64x16xbf16>, vector<4x16xf32> -> vector<4x16xf32>
    %33 = vector.broadcast %31 : vector<1x16xf32> to vector<4x16xf32>
    %34 = arith.addf %32, %33 : vector<4x16xf32>
    %35 = arith.truncf %34 : vector<4x16xf32> to vector<4x16xbf16>
    %c0_19 = arith.constant 0 : index
    %c0_20 = arith.constant 0 : index
    %36 = vector.load %arg8[%c0_19, %c0_20] : memref<16x64xbf16, #tpu.memory_space<vmem>>, vector<16x64xbf16>
    %c0_21 = arith.constant 0 : index
    %c0_22 = arith.constant 0 : index
    %37 = vector.load %arg9[%c0_21, %c0_22] : memref<1x64xf32, #tpu.memory_space<vmem>>, vector<1x64xf32>
    %cst_23 = arith.constant dense<0.000000e+00> : vector<4x64xf32>
    %38 = tpu.matmul %35, %36, %cst_23 {dimension_numbers = #tpu.dot_dimension_numbers<[1], [0], [0], [1], [0, 0, 1, 1], [], []>} : vector<4x16xbf16>, vector<16x64xbf16>, vector<4x64xf32> -> vector<4x64xf32>
    %39 = vector.broadcast %37 : vector<1x64xf32> to vector<4x64xf32>
    %40 = arith.addf %38, %39 : vector<4x64xf32>
    %cst_24 = arith.constant 0.000000e+00 : f32
    %41 = vector.broadcast %cst_24 : f32 to vector<4x64xf32>
    %42 = arith.maximumf %40, %41 : vector<4x64xf32>
    %43 = math.absf %40 : vector<4x64xf32>
    %cst_25 = arith.constant 0.000000e+00 : f32
    %44 = vector.broadcast %cst_25 : f32 to vector<4x64xf32>
    %45 = arith.subf %44, %43 : vector<4x64xf32>
    %46 = math.exp %45 : vector<4x64xf32>
    %47 = math.log1p %46 : vector<4x64xf32>
    %48 = arith.addf %42, %47 : vector<4x64xf32>
    %49 = arith.truncf %48 : vector<4x64xf32> to vector<4x64xbf16>
    %c0_26 = arith.constant 0 : index
    %c0_27 = arith.constant 0 : index
    %50 = vector.load %arg10[%c0_26, %c0_27] : memref<64x128xbf16, #tpu.memory_space<vmem>>, vector<64x128xbf16>
    %c0_28 = arith.constant 0 : index
    %c0_29 = arith.constant 0 : index
    %51 = vector.load %arg11[%c0_28, %c0_29] : memref<1x128xf32, #tpu.memory_space<vmem>>, vector<1x128xf32>
    %cst_30 = arith.constant dense<0.000000e+00> : vector<4x128xf32>
    %52 = tpu.matmul %49, %50, %cst_30 {dimension_numbers = #tpu.dot_dimension_numbers<[1], [0], [0], [1], [0, 0, 1, 1], [], []>} : vector<4x64xbf16>, vector<64x128xbf16>, vector<4x128xf32> -> vector<4x128xf32>
    %53 = vector.broadcast %51 : vector<1x128xf32> to vector<4x128xf32>
    %54 = arith.addf %52, %53 : vector<4x128xf32>
    %cst_31 = arith.constant 0.000000e+00 : f32
    %55 = vector.broadcast %cst_31 : f32 to vector<4x128xf32>
    %56 = arith.maximumf %54, %55 : vector<4x128xf32>
    %57 = math.absf %54 : vector<4x128xf32>
    %cst_32 = arith.constant 0.000000e+00 : f32
    %58 = vector.broadcast %cst_32 : f32 to vector<4x128xf32>
    %59 = arith.subf %58, %57 : vector<4x128xf32>
    %60 = math.exp %59 : vector<4x128xf32>
    %61 = math.log1p %60 : vector<4x128xf32>
    %62 = arith.addf %56, %61 : vector<4x128xf32>
    %63 = arith.truncf %62 : vector<4x128xf32> to vector<4x128xbf16>
    %c0_33 = arith.constant 0 : index
    %c0_34 = arith.constant 0 : index
    %64 = vector.load %arg12[%c0_33, %c0_34] : memref<128x256xbf16, #tpu.memory_space<vmem>>, vector<128x256xbf16>
    %c0_35 = arith.constant 0 : index
    %c0_36 = arith.constant 0 : index
    %65 = vector.load %arg13[%c0_35, %c0_36] : memref<1x256xf32, #tpu.memory_space<vmem>>, vector<1x256xf32>
    %cst_37 = arith.constant dense<0.000000e+00> : vector<4x256xf32>
    %66 = tpu.matmul %63, %64, %cst_37 {dimension_numbers = #tpu.dot_dimension_numbers<[1], [0], [0], [1], [0, 0, 1, 1], [], []>} : vector<4x128xbf16>, vector<128x256xbf16>, vector<4x256xf32> -> vector<4x256xf32>
    %67 = vector.broadcast %65 : vector<1x256xf32> to vector<4x256xf32>
    %68 = arith.addf %66, %67 : vector<4x256xf32>
    %69 = arith.truncf %68 : vector<4x256xf32> to vector<4x256xbf16>
    %c0_38 = arith.constant 0 : index
    %c0_39 = arith.constant 0 : index
    %70 = vector.load %arg14[%c0_38, %c0_39] : memref<4x256xbf16, #tpu.memory_space<vmem>>, vector<4x256xbf16>
    tpu.vector_store %arg14[%c0_38, %c0_39], %69 {strides = array<i32>} : memref<4x256xbf16, #tpu.memory_space<vmem>>, vector<4x256xbf16>,
    return
  }
  func.func @transform_0(%arg0: i32) -> (i32, i32) {
    %c0_i32 = arith.constant 0 : i32
    %c0_i32_0 = arith.constant 0 : i32
    return %arg0, %c0_i32 : i32, i32
  }
  func.func @transform_1(%arg0: i32) -> (i32, i32) {
    %c0_i32 = arith.constant 0 : i32
    %c0_i32_0 = arith.constant 0 : i32
    %c0_i32_1 = arith.constant 0 : i32
    return %c0_i32, %c0_i32_0 : i32, i32
  }
  func.func @transform_2(%arg0: i32) -> (i32, i32) {
    %c0_i32 = arith.constant 0 : i32
    %c0_i32_0 = arith.constant 0 : i32
    %c0_i32_1 = arith.constant 0 : i32
    return %c0_i32, %c0_i32_0 : i32, i32
  }
  func.func @transform_3(%arg0: i32) -> (i32, i32) {
    %c0_i32 = arith.constant 0 : i32
    %c0_i32_0 = arith.constant 0 : i32
    %c0_i32_1 = arith.constant 0 : i32
    return %c0_i32, %c0_i32_0 : i32, i32
  }
  func.func @transform_4(%arg0: i32) -> (i32, i32) {
    %c0_i32 = arith.constant 0 : i32
    %c0_i32_0 = arith.constant 0 : i32
    %c0_i32_1 = arith.constant 0 : i32
    return %c0_i32, %c0_i32_0 : i32, i32
  }
  func.func @transform_5(%arg0: i32) -> (i32, i32) {
    %c0_i32 = arith.constant 0 : i32
    %c0_i32_0 = arith.constant 0 : i32
    %c0_i32_1 = arith.constant 0 : i32
    return %c0_i32, %c0_i32_0 : i32, i32
  }
  func.func @transform_6(%arg0: i32) -> (i32, i32) {
    %c0_i32 = arith.constant 0 : i32
    %c0_i32_0 = arith.constant 0 : i32
    %c0_i32_1 = arith.constant 0 : i32
    return %c0_i32, %c0_i32_0 : i32, i32
  }
  func.func @transform_7(%arg0: i32) -> (i32, i32) {
    %c0_i32 = arith.constant 0 : i32
    %c0_i32_0 = arith.constant 0 : i32
    %c0_i32_1 = arith.constant 0 : i32
    return %c0_i32, %c0_i32_0 : i32, i32
  }
  func.func @transform_8(%arg0: i32) -> (i32, i32) {
    %c0_i32 = arith.constant 0 : i32
    %c0_i32_0 = arith.constant 0 : i32
    %c0_i32_1 = arith.constant 0 : i32
    return %c0_i32, %c0_i32_0 : i32, i32
  }
  func.func @transform_9(%arg0: i32) -> (i32, i32) {
    %c0_i32 = arith.constant 0 : i32
    %c0_i32_0 = arith.constant 0 : i32
    %c0_i32_1 = arith.constant 0 : i32
    return %c0_i32, %c0_i32_0 : i32, i32
  }
  func.func @transform_10(%arg0: i32) -> (i32, i32) {
    %c0_i32 = arith.constant 0 : i32
    %c0_i32_0 = arith.constant 0 : i32
    %c0_i32_1 = arith.constant 0 : i32
    return %c0_i32, %c0_i32_0 : i32, i32
  }
  func.func @transform_11(%arg0: i32) -> (i32, i32) {
    %c0_i32 = arith.constant 0 : i32
    %c0_i32_0 = arith.constant 0 : i32
    %c0_i32_1 = arith.constant 0 : i32
    return %c0_i32, %c0_i32_0 : i32, i32
  }
  func.func @transform_12(%arg0: i32) -> (i32, i32) {
    %c0_i32 = arith.constant 0 : i32
    %c0_i32_0 = arith.constant 0 : i32
    %c0_i32_1 = arith.constant 0 : i32
    return %c0_i32, %c0_i32_0 : i32, i32
  }
  func.func @transform_13(%arg0: i32) -> (i32, i32) {
    %c0_i32 = arith.constant 0 : i32
    %c0_i32_0 = arith.constant 0 : i32
    return %arg0, %c0_i32 : i32, i32
  }
}

</mosaic_0001>

<bundles_post_ra>
// kernel: tpu_custom_call.1
= control target key start
LH: loop header
LB: loop body
LE: loop exit
PB: predicated region body
PF: predicated region fallthrough
CT: control target
= control target key end

     0   :  { %18 = vsyncpa [#allocation3], 0  ;;  %s1508_s0 = inlined_call_operand.vmem [shape: f32[4,256], index: 0, kind: input, shape index: {}]   ;;  %s1509_s1 = inlined_call_operand.vmem [shape: bf16[256,128], index: 1, kind: input, shape index: {}]   ;;  %s1510_s2 = inlined_call_operand.hbm [shape: f32[1,128], index: 2, kind: input, shape index: {}]   ;;  %s1511_s3 = inlined_call_operand.vmem [shape: bf16[128,64], index: 3, kind: input, shape index: {}]   ;;  %s1512_s4 = inlined_call_operand.hbm [shape: f32[1,64], index: 4, kind: input, shape index: {}]   ;;  %s1513_s5 = inlined_call_operand.vmem [shape: bf16[64,16], index: 5, kind: input, shape index: {}]   ;;  %s1514_s6 = inlined_call_operand.hbm [shape: f32[1,16], index: 6, kind: input, shape index: {}]   ;;  %s1515_s7 = inlined_call_operand.hbm [shape: bf16[16,64], index: 7, kind: input, shape index: {}]   ;;  %s1516_s8 = inlined_call_operand.vmem [shape: f32[1,64], index: 8, kind: input, shape index: {}]   ;;  %s1517_s9 = inlined_call_operand.hbm [shape: bf16[64,128], index: 9, kind: input, shape index: {}]   ;;  %s1518_s10 = inlined_call_operand.vmem [shape: f32[1,128], index: 10, kind: input, shape index: {}]   ;;  %s1519_s11 = inlined_call_operand.hbm [shape: bf16[128,256], index: 11, kind: input, shape index: {}]   ;;  %s1520_s12 = inlined_call_operand.vmem [shape: f32[1,256], index: 12, kind: input, shape index: {}]   ;;  %s1521_s13 = inlined_call_operand.hbm [shape: bf16[4,256], index: 13, kind: output, shape index: {}]  }
   0x1   :  { %19 = vsyncpa [#allocation6], 0 }
   0x2   :  { %20 = vsyncpa [#allocation9], 0 }
   0x3   :  { %21 = vsyncpa [#allocation12], 0 }
   0x4   :  { %22 = vsyncpa [#allocation4], 0  ;;  %s1274_s25 = smov [#allocation5]   ;;  %s1275_s27 = smov [#allocation8]  }
   0x5   :  { %s45_s26 = sshll.u32 %s1274_s25, 4  ;;  %s66_s28 = sshll.u32 %s1275_s27, 4  ;;  %s46_s26 = int_to_ptr.vmem [resolvable:$true] %s45_s26  ;;  %s67_s28 = int_to_ptr.vmem [resolvable:$true] %s66_s28 }
   0x6   :  { %s1132_s29 = scalar_lea.vmem %s46_s26, 16  ;;  %s1136_s30 = scalar_lea.vmem %s46_s26, 32 }
   0x7   :  { %p1133_p0 = scmp.ne.s32.totalorder %s46_s26, %s1132_s29  ;;  %p1137_p1 = scmp.lt.s32.totalorder %s46_s26, %s46_s26 }
   0x8   :  { %p1138_p2 = scmp.lt.s32.totalorder %s1136_s30, %s1132_s29 }
   0xa   :  { %p1139_p3 = por %p1138_p2, %p1137_p1 }
   0xc   :  { %p1140_p4 = pnand %p1139_p3, %p1133_p0 }
   0xe   :  { %1143 = shalt.err (!%p1140_p4)
}
   0xf   :  { %48 = dma.hbm_to_vmem [thread:$0]  %s1512_s4, 16, %s46_s26, [#allocation6]  }
  0x10   :  { %s1152_s16 = scalar_lea.vmem %s67_s28, 128  ;;  %p1157_p6 = scmp.lt.s32.totalorder %s67_s28, %s67_s28 }
  0x11   :  { %p1153_p5 = scmp.ne.s32.totalorder %s67_s28, %s1152_s16  ;;  %p1158_p7 = scmp.lt.s32.totalorder %s1152_s16, %s1152_s16 }
  0x13   :  { %p1159_p8 = por %p1158_p7, %p1157_p6 }
  0x15   :  { %p1160_p9 = pnand %p1159_p8, %p1153_p5 }
  0x17   :  { %1163 = shalt.err (!%p1160_p9)
}
  0x18   :  { %s1276_s17 = smov 64   ;;  %s1277_s18 = smov 4  }
  0x19   :  { %72 = dma.hbm_to_vmem [thread:$0]  %s1515_s7, 128, %s67_s28, [#allocation9], %s1276_s17, %s1276_s17, %s1277_s18  }
  0x1a   :  { %s1278_s21 = smov [#allocation2]   ;;  %s1279_s23 = smov [#allocation7]  }
  0x1b   :  { %s33_s22 = sshll.u32 %s1278_s21, 4  ;;  %s57_s4 = sshll.u32 %s1279_s23, 4  ;;  %s34_s22 = int_to_ptr.vmem [resolvable:$true] %s33_s22  ;;  %s58_s4 = int_to_ptr.vmem [resolvable:$true] %s57_s4 }
  0x1c   :  { %s1172_s24 = scalar_lea.vmem %s34_s22, 16  ;;  %s1176_s25 = scalar_lea.vmem %s34_s22, 32 }
  0x1d   :  { %p1173_p10 = scmp.ne.s32.totalorder %s34_s22, %s1172_s24  ;;  %p1177_p11 = scmp.lt.s32.totalorder %s34_s22, %s34_s22 }
  0x1e   :  { %p1178_p12 = scmp.lt.s32.totalorder %s1176_s25, %s1172_s24 }
  0x20   :  { %p1179_p13 = por %p1178_p12, %p1177_p11 }
  0x22   :  { %p1180_p0 = pnand %p1179_p13, %p1173_p10 }
  0x24   :  { %1183 = shalt.err (!%p1180_p0)
}
  0x25   :  { %36 = dma.hbm_to_vmem [thread:$0]  %s1510_s2, 16, %s34_s22, [#allocation3]  }
  0x26   :  { %s1192_s29 = scalar_lea.vmem %s58_s4, 16  ;;  %s1196_s7 = scalar_lea.vmem %s58_s4, 32 }
  0x27   :  { %p1193_p1 = scmp.ne.s32.totalorder %s58_s4, %s1192_s29  ;;  %p1197_p2 = scmp.lt.s32.totalorder %s58_s4, %s58_s4 }
  0x28   :  { %p1198_p3 = scmp.lt.s32.totalorder %s1196_s7, %s1192_s29 }
  0x2a   :  { %p1199_p4 = por %p1198_p3, %p1197_p2 }
  0x2c   :  { %p1200_p5 = pnand %p1199_p4, %p1193_p1 }
  0x2e   :  { %1203 = shalt.err (!%p1200_p5)
}
  0x2f   :  { %60 = dma.hbm_to_vmem [thread:$0]  %s1514_s6, 16, %s58_s4, [#allocation6]  }
  0x30   :  { %s1280_s14 = smov [#allocation10]   ;;  %s1281_s16 = smov [#allocation11]  }
  0x31   :  { %s80_s15 = sshll.u32 %s1280_s14, 4  ;;  %s94_s19 = sshll.u32 %s1281_s16, 4  ;;  %s81_s15 = int_to_ptr.vmem [resolvable:$true] %s80_s15  ;;  %s95_s19 = int_to_ptr.vmem [resolvable:$true] %s94_s19 }
  0x32   :  { %s1212_s20 = scalar_lea.vmem %s81_s15, 512  ;;  %p1217_p7 = scmp.lt.s32.totalorder %s81_s15, %s81_s15 }
  0x33   :  { %p1213_p6 = scmp.ne.s32.totalorder %s81_s15, %s1212_s20  ;;  %p1218_p8 = scmp.lt.s32.totalorder %s1212_s20, %s1212_s20 }
  0x35   :  { %p1219_p9 = por %p1218_p8, %p1217_p7 }
  0x37   :  { %p1220_p10 = pnand %p1219_p9, %p1213_p6 }
  0x39   :  { %1223 = shalt.err (!%p1220_p10)
}
  0x3a   :  { %86 = dma.hbm_to_vmem [thread:$0]  %s1517_s9, 512, %s81_s15, [#allocation9], %s1276_s17, %s1276_s17, %s1277_s18  }
  0x3b   :  { %s1232_s6 = scalar_lea.vmem %s95_s19, 2048  ;;  %p1237_p12 = scmp.lt.s32.totalorder %s95_s19, %s95_s19 }
  0x3c   :  { %p1233_p11 = scmp.ne.s32.totalorder %s95_s19, %s1232_s6  ;;  %p1238_p13 = scmp.lt.s32.totalorder %s1232_s6, %s1232_s6 }
  0x3e   :  { %p1239_p0 = por %p1238_p13, %p1237_p12 }
  0x40   :  { %p1240_p1 = pnand %p1239_p0, %p1233_p11 }
  0x42   :  { %1243 = shalt.err (!%p1240_p1)
}
  0x43   :  { %s1282_s22 = smov 128   ;;  %s1283_s23 = smov 8  }
  0x44   :  { %100 = dma.hbm_to_vmem [thread:$0]  %s1519_s11, 2048, %s95_s19, [#allocation12], %s1282_s22, %s1282_s22, %s1283_s23  }
  0x45   :  { %1264 = dma.done.wait [#allocation3], 16  }
  0x46   :  { %1265 = vsyncadd [#allocation3], 4294967280 }
  0x47   :  { %1266 = dma.done.wait [#allocation6], 32  }
  0x48   :  { %1267 = vsyncadd [#allocation6], 4294967264 }
  0x49   :  { %1268 = dma.done.wait [#allocation9], 640  }
  0x4a   :  { %1269 = vsyncadd [#allocation9], 4294966656 }
  0x4b   :  { %1270 = dma.done.wait [#allocation12], 2048  }
  0x4c   :  { %1271 = vsyncadd [#allocation12], 4294965248  ;;  %v1050_v0 = vld [vmem:[%s1509_s1 + $0x78] sm:$0xff]   ;;  %v1052_v2 = vld [vmem:[%s1509_s1 + $0x70] sm:$0xff]   ;;  %v1284_v21 = vmov 0.0   ;;  %vm1285_vm0 = vmmov 0  }
  0x4d   :  { %v1051_v1 = vld [vmem:[%s1509_s1 + $0x38] sm:$0xff]   ;;  %943 = vmatprep.subr.bf16.mxu0 %v1050_v0  ;;  %v1053_v3 = vld [vmem:[%s1509_s1 + $0x30] sm:$0xff]   ;;  %v1054_v4 = vld [vmem:[%s1509_s1 + $0x68] sm:$0xff]   ;;  %986 = vmatprep.subr.bf16.mxu1 %v1284_v21  ;;  %vm485_vm3 = vcmask 523264   ;;  %vm545_vm4 = vcmask 130048   ;;  %s1287_s14 = smov [#allocation13]  }
  0x4e   :  { %944 = vmatpush3.bf16.msra.mxu0 %v1051_v1  ;;  %v1055_v5 = vld [vmem:[%s1509_s1 + $0x28] sm:$0xff]   ;;  %v1056_v6 = vld [vmem:[%s1509_s1 + $0x60] sm:$0xff]   ;;  %v1058_v8 = vld [vmem:[%s1509_s1 + $0x58] sm:$0xff]   ;;  %1002 = vmatprep.mubr.msk.bf16.mxu1 %vm1285_vm0, %v1284_v21  ;;  %s872_s15 = sshll.u32 %s1287_s14, 4  ;;  %s873_s15 = int_to_ptr.vmem [resolvable:$true] %s872_s15 }
  0x4f   :  { %945 = vmatprep.subr.bf16.mxu0 %v1052_v2  ;;  %v1057_v7 = vld [vmem:[%s1509_s1 + $0x20] sm:$0xff]   ;;  %v1059_v9 = vld [vmem:[%s1509_s1 + $0x18] sm:$0xff]   ;;  %v1060_v10 = vld [vmem:[%s1509_s1 + $0x50] sm:$0xff]   ;;  %s1244_s16 = scalar_lea.vmem %s873_s15, 64  ;;  %p1249_p3 = scmp.lt.s32.totalorder %s873_s15, %s873_s15 }
  0x50   :  { %v122_v11 = vld [vmem:[%s1508_s0] sm:$0xff]  ;;  %v1061_v12 = vld [vmem:[%s1509_s1 + $0x10] sm:$0xff]   ;;  %v1062_v14 = vld [vmem:[%s1509_s1 + $0x48] sm:$0xff]   ;;  %p1245_p2 = scmp.ne.s32.totalorder %s873_s15, %s1244_s16  ;;  %p1250_p4 = scmp.lt.s32.totalorder %s1244_s16, %s1244_s16 }
  0x51   :  { %v124_v13 = vcombine.high %v122_v11, %v122_v11  ;;  %v1063_v16 = vld [vmem:[%s1509_s1 + $0x8] sm:$0xff]   ;;  %v1064_v17 = vld [vmem:[%s1509_s1 + $0x40] sm:$0xff]   ;;  %v126_v19 = vpack.c.bf16 %v122_v11, %v122_v11  ;;  %v1067_v20 = vld [vmem:[%s1511_s3 + $0x38] sm:$0xff]  }
  0x52   :  { %946 = vmatpush3.bf16.msra.mxu0 %v1053_v3  ;;  %v1065_v18 = vld [vmem:[%s1509_s1] sm:$0xff]   ;;  %987 = vmatpush3.bf16.msra.mxu1 %v1067_v20  ;;  %v1068_v22 = vld [vmem:[%s1511_s3 + $0x30] sm:$0xff]   ;;  %v1069_v23 = vld [vmem:[%s1511_s3 + $0x28] sm:$0xff]   ;;  %p1251_p5 = por %p1250_p4, %p1249_p3 }
  0x53   :  { %947 = vmatprep.subr.bf16.mxu0 %v1054_v4  ;;  %v127_v15 = vpack.c.bf16 %v124_v13, %v124_v13  ;;  %988 = vmatprep.subr.bf16.mxu1 %v1284_v21  ;;  %v1070_v24 = vld [vmem:[%s1511_s3 + $0x20] sm:$0xff]   ;;  %v1071_v25 = vld [vmem:[%s1511_s3 + $0x18] sm:$0xff]   ;;  %v1072_v26 = vld [vmem:[%s1511_s3 + $0x10] sm:$0xff]  }
  0x54   :  { %v1073_v27 = vld [vmem:[%s1511_s3 + $0x8] sm:$0xff]   ;;  %v1074_v28 = vld [vmem:[%s1511_s3] sm:$0xff]   ;;  %v1075_v51 = vld [vmem:[%s1513_s5 + $0x18] sm:$0xff]   ;;  %p1252_p6 = pnand %p1251_p5, %p1245_p2 }
  0x55   :  { %295 = vmatprep.mubr.bf16.mxu0 %v127_v15  ;;  %v884_v30 = vld [vmem:[#allocation2] ss:$0 sm:$0xff]  ;;  %v1076_v52 = vld [vmem:[%s1513_s5 + $0x10] sm:$0xff]   ;;  %v1077_v53 = vld [vmem:[%s1513_s5 + $0x8] sm:$0xff]  }
  0x56   :  { %948 = vmatpush3.bf16.msra.mxu0 %v1055_v5  ;;  %989 = vmatpush3.bf16.msra.mxu1 %v1068_v22  ;;  %v1078_v54 = vld [vmem:[%s1513_s5] sm:$0xff]  }
  0x57   :  { %949 = vmatprep.subr.bf16.mxu0 %v1056_v6  ;;  %990 = vmatprep.subr.bf16.mxu1 %v1284_v21  ;;  %v901_v55 = vld [vmem:[#allocation5] ss:$0 sm:$0xff]  ;;  %v1079_v11 = vld [vmem:[#allocation8] sm:$0xff]   ;;  %v910_v13 = vld [vmem:[#allocation7] ss:$0 sm:$0xff] }
  0x58   :  { %v1080_v20 = vld [vmem:[#allocation10 + $0x18] sm:$0xff]   ;;  %v1081_v22 = vld [vmem:[#allocation10 + $0x10] sm:$0xff]  }
  0x5a   :  { %950 = vmatpush3.bf16.msra.mxu0 %v1057_v7  ;;  %991 = vmatpush3.bf16.msra.mxu1 %v1069_v23  ;;  %v1082_v23 = vld [vmem:[#allocation10 + $0x8] sm:$0xff]  }
  0x5b   :  { %951 = vmatprep.subr.bf16.mxu0 %v1058_v8  ;;  %992 = vmatprep.subr.bf16.mxu1 %v1284_v21 }
  0x5e   :  { %952 = vmatpush3.bf16.msra.mxu0 %v1059_v9  ;;  %993 = vmatpush3.bf16.msra.mxu1 %v1070_v24  ;;  %v1083_v24 = vld [vmem:[#allocation10] sm:$0xff]  }
  0x5f   :  { %953 = vmatprep.subr.bf16.mxu0 %v1060_v10  ;;  %994 = vmatprep.subr.bf16.mxu1 %v1284_v21 }
  0x62   :  { %954 = vmatpush3.bf16.msra.mxu0 %v1061_v12  ;;  %995 = vmatpush3.bf16.msra.mxu1 %v1071_v25  ;;  %v916_v25 = vld [vmem:[%s1516_s8] ss:$0 sm:$0xff] }
  0x63   :  { %955 = vmatprep.subr.bf16.mxu0 %v1062_v14  ;;  %996 = vmatprep.subr.bf16.mxu1 %v1284_v21 }
  0x66   :  { %956 = vmatpush3.bf16.msra.mxu0 %v1063_v16  ;;  %997 = vmatpush3.bf16.msra.mxu1 %v1072_v26 }
  0x67   :  { %957 = vmatprep.subr.bf16.mxu0 %v1064_v17  ;;  %998 = vmatprep.subr.bf16.mxu1 %v1284_v21 }
  0x6a   :  { %958 = vmatpush3.bf16.msra.mxu0 %v1065_v18  ;;  %999 = vmatpush3.bf16.msra.mxu1 %v1073_v27 }
  0x6b   :  { %1000 = vmatprep.subr.bf16.mxu1 %v1284_v21 }
  0x6d   :  { %296 = vmatmul.mubr.bf16.vlgmr.msra.gmra.mxu0 %v126_v19 }
  0x6e   :  { %1001 = vmatpush3.bf16.msra.mxu1 %v1074_v28 }
  0x6f   :  { %1006 = vmatprep.subr.bf16.mxu1 %v1284_v21 }
 0x12d   :  { %v959_v29 = vpop.f32.mrf.mxu0 }
 0x12f   :  { %v960_v31 = vpop.f32.mrf.mxu0 }
 0x130   :  { %v961_v32 = vadd.f32 %v960_v31, %v959_v29 }
 0x131   :  { %v962_v33 = vpop.f32.mrf.mxu0 }
 0x132   :  { %v298_v34 = vadd.f32 %v961_v32, %v884_v30 }
 0x133   :  { %v963_v35 = vpop.f32.mrf.mxu0 }
 0x134   :  { %v304_v36 = vand.u32 2147483647, %v298_v34  ;;  %v303_v47 = vmax.f32 %v298_v34, 0.0 }
 0x136   :  { %v305_v37 = vsub.f32 0.0, %v304_v36 }
 0x138   :  { %v306_v38 = vmul.f32 1.442695, %v305_v37 }
 0x13a   :  { %1108 = vpow2.f32 %v306_v38 }
 0x147   :  { %v1109_v39 = vpop.eup %1108 }
 0x148   :  { %v308_v40 = vadd.f32 1.0, %v1109_v39  ;;  %v311_v41 = vmul.f32 -0.5, %v1109_v39  ;;  %v314_v43 = vand.u32 2147483647, %v1109_v39 }
 0x14a   :  { %1110 = vlog2.f32 %v308_v40  ;;  %v312_v42 = vadd.f32 1.0, %v311_v41  ;;  %vm315_vm1 = vcmp.lt.f32.partialorder %v314_v43, 0.0004427343 }
 0x14c   :  { %v313_v46 = vmul.f32 %v1109_v39, %v312_v42 }
 0x157   :  { %v1111_v44 = vpop.eup %1110 }
 0x158   :  { %v310_v45 = vmul.f32 0.6931472, %v1111_v44 }
 0x15a   :  { %v316_v48 = vsel %vm315_vm1, %v313_v46, %v310_v45  ;;  %v1086_v45 = vld [vmem:[#allocation11 + $0x74] ss:$8 sps:$4 sm:$0xff]   ;;  %v1084_v46 = vld [vmem:[#allocation11 + $0x70] ss:$8 sps:$4 sm:$0xff]  }
 0x15b   :  { %v317_v49 = vadd.f32 %v316_v48, %v303_v47  ;;  %811 = vmatprep.subr.bf16.mxu0 %v1086_v45  ;;  %v1089_v47 = vld [vmem:[#allocation11 + $0x64] ss:$8 sps:$4 sm:$0xff]   ;;  %v1087_v48 = vld [vmem:[#allocation11 + $0x60] ss:$8 sps:$4 sm:$0xff]  }
 0x15c   :  { %812 = vmatpush1.bf16.msra.mxu0 %v1084_v46 }
 0x15d   :  { %v318_v50 = vpack.c.bf16 %v317_v49, %v317_v49  ;;  %813 = vmatprep.subr.bf16.mxu0 %v1089_v47  ;;  %v1092_v49 = vld [vmem:[#allocation11 + $0x54] ss:$8 sps:$4 sm:$0xff]  }
 0x15f   :  { %1003 = vmatmul.mubr.bf16.vlgmr.msra.gmra.mxu1 %v318_v50  ;;  %v1090_v50 = vld [vmem:[#allocation11 + $0x50] ss:$8 sps:$4 sm:$0xff]  }
 0x160   :  { %1014 = vmatprep.mubr.msk.bf16.mxu1 %vm1285_vm0, %v1284_v21  ;;  %1007 = vmatpush3.bf16.msra.mxu1 %v1075_v51  ;;  %v1095_v51 = vld [vmem:[#allocation11 + $0x44] ss:$8 sps:$4 sm:$0xff]  }
 0x161   :  { %1008 = vmatprep.subr.bf16.mxu1 %v1284_v21  ;;  %814 = vmatpush1.bf16.msra.mxu0 %v1087_v48 }
 0x162   :  { %815 = vmatprep.subr.bf16.mxu0 %v1092_v49 }
 0x164   :  { %1009 = vmatpush3.bf16.msra.mxu1 %v1076_v52  ;;  %v1093_v52 = vld [vmem:[#allocation11 + $0x40] ss:$8 sps:$4 sm:$0xff]  }
 0x165   :  { %1010 = vmatprep.subr.bf16.mxu1 %v1284_v21  ;;  %816 = vmatpush1.bf16.msra.mxu0 %v1090_v50 }
 0x166   :  { %817 = vmatprep.subr.bf16.mxu0 %v1095_v51 }
 0x168   :  { %1011 = vmatpush3.bf16.msra.mxu1 %v1077_v53  ;;  %v1098_v53 = vld [vmem:[#allocation11 + $0x34] ss:$8 sps:$4 sm:$0xff]  }
 0x169   :  { %1012 = vmatprep.subr.bf16.mxu1 %v1284_v21  ;;  %818 = vmatpush1.bf16.msra.mxu0 %v1093_v52 }
 0x16a   :  { %819 = vmatprep.subr.bf16.mxu0 %v1098_v53 }
 0x16c   :  { %1013 = vmatpush3.bf16.msra.mxu1 %v1078_v54  ;;  %v1096_v54 = vld [vmem:[#allocation11 + $0x30] ss:$8 sps:$4 sm:$0xff]  }
 0x16d   :  { %1018 = vmatprep.subr.bf16.mxu1 %v1284_v21  ;;  %820 = vmatpush1.bf16.msra.mxu0 %v1096_v54 }
 0x21f   :  { %v424_v56 = vpop.f32.mrf.mxu1 }
 0x220   :  { %v425_v57 = vadd.f32 %v901_v55, %v424_v56  ;;  %v1101_v55 = vld [vmem:[#allocation11 + $0x24] ss:$8 sps:$4 sm:$0xff]   ;;  %v1099_v56 = vld [vmem:[#allocation11 + $0x20] ss:$8 sps:$4 sm:$0xff]  }
 0x221   :  { %v1004_v58 = vpop.f32.mrf.mxu1  ;;  %821 = vmatprep.subr.bf16.mxu0 %v1101_v55 }
 0x222   :  { %v431_v59 = vand.u32 2147483647, %v425_v57  ;;  %v430_v8 = vmax.f32 %v425_v57, 0.0  ;;  %822 = vmatpush1.bf16.msra.mxu0 %v1099_v56  ;;  %v1104_v57 = vld [vmem:[#allocation11 + $0x14] ss:$8 sps:$4 sm:$0xff]  }
 0x223   :  { %v427_v60 = vpop.f32.mrf.mxu1  ;;  %v1102_v58 = vld [vmem:[#allocation11 + $0x10] ss:$8 sps:$4 sm:$0xff]   ;;  %823 = vmatprep.subr.bf16.mxu0 %v1104_v57 }
 0x224   :  { %v432_v61 = vsub.f32 0.0, %v431_v59  ;;  %v1107_v59 = vld [vmem:[#allocation11 + $0x4] ss:$8 sps:$4 sm:$0xff]   ;;  %v1105_v60 = vld [vmem:[#allocation11] ss:$8 sps:$4 sm:$0xff]  }
 0x225   :  { %v1005_v62 = vpop.f32.mrf.mxu1 }
 0x226   :  { %v433_v63 = vmul.f32 1.442695, %v432_v61  ;;  %824 = vmatpush1.bf16.msra.mxu0 %v1102_v58  ;;  %v1286_v61 = vmov 0   ;;  %v919_v62 = vld [vmem:[%s1518_s10] ss:$0 sm:$0xff] }
 0x227   :  { %825 = vmatprep.subr.bf16.mxu0 %v1107_v59  ;;  %843 = vmatprep.mubr.bf16.mxu0 %v1286_v61 }
 0x228   :  { %1112 = vpow2.f32 %v433_v63 }
 0x22a   :  { %826 = vmatpush1.bf16.msra.mxu0 %v1105_v60 }
 0x235   :  { %v1113_v0 = vpop.eup %1112 }
 0x236   :  { %v435_v1 = vadd.f32 1.0, %v1113_v0  ;;  %v438_v2 = vmul.f32 -0.5, %v1113_v0  ;;  %v441_v4 = vand.u32 2147483647, %v1113_v0 }
 0x238   :  { %1114 = vlog2.f32 %v435_v1  ;;  %v439_v3 = vadd.f32 1.0, %v438_v2  ;;  %vm442_vm2 = vcmp.lt.f32.partialorder %v441_v4, 0.0004427343 }
 0x23a   :  { %v440_v7 = vmul.f32 %v1113_v0, %v439_v3 }
 0x245   :  { %v1115_v5 = vpop.eup %1114 }
 0x246   :  { %v437_v6 = vmul.f32 0.6931472, %v1115_v5 }
 0x248   :  { %v443_v9 = vsel %vm442_vm2, %v440_v7, %v437_v6 }
 0x249   :  { %v444_v10 = vadd.f32 %v443_v9, %v430_v8 }
 0x24b   :  { %v445_v12 = vpack.c.bf16 %v444_v10, %v444_v10 }
 0x24d   :  { %1015 = vmatmul.mubr.msk.bf16.vlgmr.msra.gmra.mxu1 %vm485_vm3, %v445_v12 }
 0x24e   :  { %1019 = vmatpush3.bf16.msra.mxu1 %v1079_v11  ;;  %1020 = vmatprep.mubr.msk.bf16.mxu1 %vm1285_vm0, %v1284_v21 }
 0x24f   :  { %1024 = vmatprep.subr.bf16.mxu1 %v1284_v21 }
 0x30d   :  { %v523_v14 = vpop.f32.mrf.mxu1 }
 0x30e   :  { %v524_v15 = vadd.f32 %v910_v13, %v523_v14 }
 0x30f   :  { %v1016_v16 = vpop.f32.mrf.mxu1 }
 0x310   :  { %v529_v17 = vpack.c.bf16 %v524_v15, %v524_v15 }
 0x311   :  { %v526_v18 = vpop.f32.mrf.mxu1 }
 0x312   :  { %1021 = vmatmul.mubr.msk.bf16.vlgmr.msra.gmra.mxu1 %vm545_vm4, %v529_v17 }
 0x313   :  { %v1017_v19 = vpop.f32.mrf.mxu1  ;;  %1032 = vmatprep.mubr.msk.bf16.mxu1 %vm1285_vm0, %v1284_v21  ;;  %1025 = vmatpush3.bf16.msra.mxu1 %v1080_v20 }
 0x314   :  { %1026 = vmatprep.subr.bf16.mxu1 %v1284_v21  ;;  %v721_v19 = vlaneseq }
 0x316   :  { %v722_v20 = vshrl.u32 %v721_v19, 7 }
 0x317   :  { %1027 = vmatpush3.bf16.msra.mxu1 %v1081_v22 }
 0x318   :  { %1028 = vmatprep.subr.bf16.mxu1 %v1284_v21  ;;  %v723_v22 = vsub.s32 0, %v722_v20 }
 0x31b   :  { %1029 = vmatpush3.bf16.msra.mxu1 %v1082_v23  ;;  %v727_v23 = vsub.s32 1, %v722_v20 }
 0x31c   :  { %1030 = vmatprep.subr.bf16.mxu1 %v1284_v21 }
 0x31f   :  { %1031 = vmatpush3.bf16.msra.mxu1 %v1083_v24  ;;  %v719_v24 = vld [vmem:[%s1520_s12] sm:$0x3] }
 0x3d2   :  { %v583_v26 = vpop.f32.mrf.mxu1 }
 0x3d3   :  { %v584_v27 = vadd.f32 %v916_v25, %v583_v26  ;;  %v724_v25 = vrot.slane %v719_v24, %v723_v22  ;;  %v728_v26 = vrot.slane %v719_v24, %v727_v23 }
 0x3d4   :  { %v1022_v28 = vpop.f32.mrf.mxu1 }
 0x3d5   :  { %v590_v29 = vand.u32 2147483647, %v584_v27  ;;  %v589_v41 = vmax.f32 %v584_v27, 0.0 }
 0x3d6   :  { %v586_v30 = vpop.f32.mrf.mxu1 }
 0x3d7   :  { %v591_v31 = vsub.f32 0.0, %v590_v29 }
 0x3d8   :  { %v1023_v32 = vpop.f32.mrf.mxu1 }
 0x3d9   :  { %v592_v33 = vmul.f32 1.442695, %v591_v31 }
 0x3db   :  { %1116 = vpow2.f32 %v592_v33 }
 0x3e8   :  { %v1117_v34 = vpop.eup %1116 }
 0x3e9   :  { %v594_v35 = vadd.f32 1.0, %v1117_v34  ;;  %v597_v36 = vmul.f32 -0.5, %v1117_v34  ;;  %v600_v37 = vand.u32 2147483647, %v1117_v34 }
 0x3eb   :  { %1118 = vlog2.f32 %v594_v35  ;;  %v598_v21 = vadd.f32 1.0, %v597_v36  ;;  %vm601_vm5 = vcmp.lt.f32.partialorder %v600_v37, 0.0004427343 }
 0x3ed   :  { %v599_v40 = vmul.f32 %v1117_v34, %v598_v21 }
 0x3f8   :  { %v1119_v38 = vpop.eup %1118 }
 0x3f9   :  { %v596_v39 = vmul.f32 0.6931472, %v1119_v38 }
 0x3fb   :  { %v602_v42 = vsel %vm601_vm5, %v599_v40, %v596_v39 }
 0x3fc   :  { %v603_v43 = vadd.f32 %v602_v42, %v589_v41 }
 0x3fe   :  { %v604_v44 = vpack.c.bf16 %v603_v43, %v603_v43 }
 0x400   :  { %1033 = vmatmul.mubr.msk.bf16.vlgmr.msra.gmra.mxu1 %vm485_vm3, %v604_v44 }
 0x4c0   :  { %v681_v63 = vpop.f32.mrf.mxu1 }
 0x4c1   :  { %v682_v0 = vadd.f32 %v919_v62, %v681_v63 }
 0x4c2   :  { %v1034_v1 = vpop.f32.mrf.mxu1 }
 0x4c3   :  { %v688_v2 = vand.u32 2147483647, %v682_v0  ;;  %v687_v15 = vmax.f32 %v682_v0, 0.0 }
 0x4c4   :  { %v684_v3 = vpop.f32.mrf.mxu1 }
 0x4c5   :  { %v689_v4 = vsub.f32 0.0, %v688_v2 }
 0x4c6   :  { %v1035_v5 = vpop.f32.mrf.mxu1 }
 0x4c7   :  { %v690_v6 = vmul.f32 1.442695, %v689_v4 }
 0x4c9   :  { %1120 = vpow2.f32 %v690_v6 }
 0x4d6   :  { %v1121_v7 = vpop.eup %1120 }
 0x4d7   :  { %v692_v8 = vadd.f32 1.0, %v1121_v7  ;;  %v695_v9 = vmul.f32 -0.5, %v1121_v7  ;;  %v698_v11 = vand.u32 2147483647, %v1121_v7 }
 0x4d9   :  { %1122 = vlog2.f32 %v692_v8  ;;  %v696_v10 = vadd.f32 1.0, %v695_v9  ;;  %vm699_vm6 = vcmp.lt.f32.partialorder %v698_v11, 0.0004427343 }
 0x4db   :  { %v697_v14 = vmul.f32 %v1121_v7, %v696_v10 }
 0x4e6   :  { %v1123_v12 = vpop.eup %1122 }
 0x4e7   :  { %v694_v13 = vmul.f32 0.6931472, %v1123_v12 }
 0x4e9   :  { %v700_v16 = vsel %vm699_vm6, %v697_v14, %v694_v13 }
 0x4ea   :  { %v701_v17 = vadd.f32 %v700_v16, %v687_v15 }
 0x4ec   :  { %v702_v18 = vpack.c.bf16 %v701_v17, %v701_v17 }
 0x4ee   :  { %844 = vmatmul.mubr.bf16.vlgmr.msra.gmra.mxu0 %v702_v18 }
 0x5ae   :  { %v845_v27 = vpop.f32.mrf.mxu0 }
 0x5af   :  { %v846_v29 = vadd.f32 %v845_v27, %v724_v25 }
 0x5b0   :  { %v847_v28 = vpop.f32.mrf.mxu0 }
 0x5b1   :  { %v848_v30 = vadd.f32 %v847_v28, %v728_v26 }
 0x5b2   :  { %v849_v31 = vpop.f32.mrf.mxu0 }
 0x5b3   :  { %v941_v32 = vpack.c.bf16 %v848_v30, %v846_v29 }
 0x5b4   :  { %v850_v33 = vpop.f32.mrf.mxu0 }
 0x5b5   :  { %942 = vst.sshfl [vmem:[#allocation13] sm:$0x33 pattern:$0x76325410] %v941_v32 }
 0x5b6   :  { %1255 = shalt.err (!%p1252_p6)
}
 0x5b7   :  { %875 = dma.vmem_to_hbm [thread:$0]  %s873_s15, 64, %s1521_s13, [#allocation4]  }
 0x5b8   :  { %1272 = dma.done.wait [#allocation4], 64  }
 0x5b9   :  { %1273 = vsyncadd [#allocation4], 4294967232 }
 0x5ba   :  { %879 = vsyncpa [#allocation3], 1 }
 0x5bb   :  { %880 = vsyncpa [#allocation6], 1 }
 0x5bc   :  { %881 = vsyncpa [#allocation9], 1 }
 0x5bd   :  { %882 = vsyncpa [#allocation12], 1 }
 0x5be   :  { %883 = vsyncpa [#allocation4], 1 }

// kernel: tpu_custom_call.1
= control target key start
LH: loop header
LB: loop body
LE: loop exit
PB: predicated region body
PF: predicated region fallthrough
CT: control target
= control target key end

     0   :  { %18 = vsyncpa [#allocation3], 0  ;;  %s1508_s0 = inlined_call_operand.vmem [shape: f32[4,256], index: 0, kind: input, shape index: {}]   ;;  %s1509_s1 = inlined_call_operand.vmem [shape: bf16[256,128], index: 1, kind: input, shape index: {}]   ;;  %s1510_s2 = inlined_call_operand.hbm [shape: f32[1,128], index: 2, kind: input, shape index: {}]   ;;  %s1511_s3 = inlined_call_operand.vmem [shape: bf16[128,64], index: 3, kind: input, shape index: {}]   ;;  %s1512_s4 = inlined_call_operand.hbm [shape: f32[1,64], index: 4, kind: input, shape index: {}]   ;;  %s1513_s5 = inlined_call_operand.vmem [shape: bf16[64,16], index: 5, kind: input, shape index: {}]   ;;  %s1514_s6 = inlined_call_operand.hbm [shape: f32[1,16], index: 6, kind: input, shape index: {}]   ;;  %s1515_s7 = inlined_call_operand.hbm [shape: bf16[16,64], index: 7, kind: input, shape index: {}]   ;;  %s1516_s8 = inlined_call_operand.vmem [shape: f32[1,64], index: 8, kind: input, shape index: {}]   ;;  %s1517_s9 = inlined_call_operand.hbm [shape: bf16[64,128], index: 9, kind: input, shape index: {}]   ;;  %s1518_s10 = inlined_call_operand.vmem [shape: f32[1,128], index: 10, kind: input, shape index: {}]   ;;  %s1519_s11 = inlined_call_operand.hbm [shape: bf16[128,256], index: 11, kind: input, shape index: {}]   ;;  %s1520_s12 = inlined_call_operand.vmem [shape: f32[1,256], index: 12, kind: input, shape index: {}]   ;;  %s1521_s13 = inlined_call_operand.hbm [shape: bf16[4,256], index: 13, kind: output, shape index: {}]  }
   0x1   :  { %19 = vsyncpa [#allocation6], 0 }
   0x2   :  { %20 = vsyncpa [#allocation9], 0 }
   0x3   :  { %21 = vsyncpa [#allocation12], 0 }
   0x4   :  { %22 = vsyncpa [#allocation4], 0  ;;  %s1274_s25 = smov [#allocation5]   ;;  %s1275_s27 = smov [#allocation8]  }
   0x5   :  { %s45_s26 = sshll.u32 %s1274_s25, 4  ;;  %s66_s28 = sshll.u32 %s1275_s27, 4  ;;  %s46_s26 = int_to_ptr.vmem [resolvable:$true] %s45_s26  ;;  %s67_s28 = int_to_ptr.vmem [resolvable:$true] %s66_s28 }
   0x6   :  { %s1132_s29 = scalar_lea.vmem %s46_s26, 16  ;;  %s1136_s30 = scalar_lea.vmem %s46_s26, 32 }
   0x7   :  { %p1133_p0 = scmp.ne.s32.totalorder %s46_s26, %s1132_s29  ;;  %p1137_p1 = scmp.lt.s32.totalorder %s46_s26, %s46_s26 }
   0x8   :  { %p1138_p2 = scmp.lt.s32.totalorder %s1136_s30, %s1132_s29 }
   0xa   :  { %p1139_p3 = por %p1138_p2, %p1137_p1 }
   0xc   :  { %p1140_p4 = pnand %p1139_p3, %p1133_p0 }
   0xe   :  { %1143 = shalt.err (!%p1140_p4)
}
   0xf   :  { %48 = dma.hbm_to_vmem [thread:$0]  %s1512_s4, 16, %s46_s26, [#allocation6]  }
  0x10   :  { %s1152_s16 = scalar_lea.vmem %s67_s28, 128  ;;  %p1157_p6 = scmp.lt.s32.totalorder %s67_s28, %s67_s28 }
  0x11   :  { %p1153_p5 = scmp.ne.s32.totalorder %s67_s28, %s1152_s16  ;;  %p1158_p7 = scmp.lt.s32.totalorder %s1152_s16, %s1152_s16 }
  0x13   :  { %p1159_p8 = por %p1158_p7, %p1157_p6 }
  0x15   :  { %p1160_p9 = pnand %p1159_p8, %p1153_p5 }
  0x17   :  { %1163 = shalt.err (!%p1160_p9)
}
  0x18   :  { %s1276_s17 = smov 64   ;;  %s1277_s18 = smov 4  }
  0x19   :  { %72 = dma.hbm_to_vmem [thread:$0]  %s1515_s7, 128, %s67_s28, [#allocation9], %s1276_s17, %s1276_s17, %s1277_s18  }
  0x1a   :  { %s1278_s21 = smov [#allocation2]   ;;  %s1279_s23 = smov [#allocation7]  }
  0x1b   :  { %s33_s22 = sshll.u32 %s1278_s21, 4  ;;  %s57_s4 = sshll.u32 %s1279_s23, 4  ;;  %s34_s22 = int_to_ptr.vmem [resolvable:$true] %s33_s22  ;;  %s58_s4 = int_to_ptr.vmem [resolvable:$true] %s57_s4 }
  0x1c   :  { %s1172_s24 = scalar_lea.vmem %s34_s22, 16  ;;  %s1176_s25 = scalar_lea.vmem %s34_s22, 32 }
  0x1d   :  { %p1173_p10 = scmp.ne.s32.totalorder %s34_s22, %s1172_s24  ;;  %p1177_p11 = scmp.lt.s32.totalorder %s34_s22, %s34_s22 }
  0x1e   :  { %p1178_p12 = scmp.lt.s32.totalorder %s1176_s25, %s1172_s24 }
  0x20   :  { %p1179_p13 = por %p1178_p12, %p1177_p11 }
  0x22   :  { %p1180_p0 = pnand %p1179_p13, %p1173_p10 }
  0x24   :  { %1183 = shalt.err (!%p1180_p0)
}
  0x25   :  { %36 = dma.hbm_to_vmem [thread:$0]  %s1510_s2, 16, %s34_s22, [#allocation3]  }
  0x26   :  { %s1192_s29 = scalar_lea.vmem %s58_s4, 16  ;;  %s1196_s7 = scalar_lea.vmem %s58_s4, 32 }
  0x27   :  { %p1193_p1 = scmp.ne.s32.totalorder %s58_s4, %s1192_s29  ;;  %p1197_p2 = scmp.lt.s32.totalorder %s58_s4, %s58_s4 }
  0x28   :  { %p1198_p3 = scmp.lt.s32.totalorder %s1196_s7, %s1192_s29 }
  0x2a   :  { %p1199_p4 = por %p1198_p3, %p1197_p2 }
  0x2c   :  { %p1200_p5 = pnand %p1199_p4, %p1193_p1 }
  0x2e   :  { %1203 = shalt.err (!%p1200_p5)
}
  0x2f   :  { %60 = dma.hbm_to_vmem [thread:$0]  %s1514_s6, 16, %s58_s4, [#allocation6]  }
  0x30   :  { %s1280_s14 = smov [#allocation10]   ;;  %s1281_s16 = smov [#allocation11]  }
  0x31   :  { %s80_s15 = sshll.u32 %s1280_s14, 4  ;;  %s94_s19 = sshll.u32 %s1281_s16, 4  ;;  %s81_s15 = int_to_ptr.vmem [resolvable:$true] %s80_s15  ;;  %s95_s19 = int_to_ptr.vmem [resolvable:$true] %s94_s19 }
  0x32   :  { %s1212_s20 = scalar_lea.vmem %s81_s15, 512  ;;  %p1217_p7 = scmp.lt.s32.totalorder %s81_s15, %s81_s15 }
  0x33   :  { %p1213_p6 = scmp.ne.s32.totalorder %s81_s15, %s1212_s20  ;;  %p1218_p8 = scmp.lt.s32.totalorder %s1212_s20, %s1212_s20 }
  0x35   :  { %p1219_p9 = por %p1218_p8, %p1217_p7 }
  0x37   :  { %p1220_p10 = pnand %p1219_p9, %p1213_p6 }
  0x39   :  { %1223 = shalt.err (!%p1220_p10)
}
  0x3a   :  { %86 = dma.hbm_to_vmem [thread:$0]  %s1517_s9, 512, %s81_s15, [#allocation9], %s1276_s17, %s1276_s17, %s1277_s18  }
  0x3b   :  { %s1232_s6 = scalar_lea.vmem %s95_s19, 2048  ;;  %p1237_p12 = scmp.lt.s32.totalorder %s95_s19, %s95_s19 }
  0x3c   :  { %p1233_p11 = scmp.ne.s32.totalorder %s95_s19, %s1232_s6  ;;  %p1238_p13 = scmp.lt.s32.totalorder %s1232_s6, %s1232_s6 }
  0x3e   :  { %p1239_p0 = por %p1238_p13, %p1237_p12 }
  0x40   :  { %p1240_p1 = pnand %p1239_p0, %p1233_p11 }
  0x42   :  { %1243 = shalt.err (!%p1240_p1)
}
  0x43   :  { %s1282_s22 = smov 128   ;;  %s1283_s23 = smov 8  }
  0x44   :  { %100 = dma.hbm_to_vmem [thread:$0]  %s1519_s11, 2048, %s95_s19, [#allocation12], %s1282_s22, %s1282_s22, %s1283_s23  }
  0x45   :  { %1264 = dma.done.wait [#allocation3], 16  }
  0x46   :  { %1265 = vsyncadd [#allocation3], 4294967280 }
  0x47   :  { %1266 = dma.done.wait [#allocation6], 32  }
  0x48   :  { %1267 = vsyncadd [#allocation6], 4294967264 }
  0x49   :  { %1268 = dma.done.wait [#allocation9], 640  }
  0x4a   :  { %1269 = vsyncadd [#allocation9], 4294966656 }
  0x4b   :  { %1270 = dma.done.wait [#allocation12], 2048  }
  0x4c   :  { %1271 = vsyncadd [#allocation12], 4294965248  ;;  %v1050_v0 = vld [vmem:[%s1509_s1 + $0x78] sm:$0xff]   ;;  %v1052_v2 = vld [vmem:[%s1509_s1 + $0x70] sm:$0xff]   ;;  %v1284_v21 = vmov 0.0   ;;  %vm1285_vm0 = vmmov 0  }
  0x4d   :  { %v1051_v1 = vld [vmem:[%s1509_s1 + $0x38] sm:$0xff]   ;;  %943 = vmatprep.subr.bf16.mxu0 %v1050_v0  ;;  %v1053_v3 = vld [vmem:[%s1509_s1 + $0x30] sm:$0xff]   ;;  %v1054_v4 = vld [vmem:[%s1509_s1 + $0x68] sm:$0xff]   ;;  %986 = vmatprep.subr.bf16.mxu1 %v1284_v21  ;;  %vm485_vm3 = vcmask 523264   ;;  %vm545_vm4 = vcmask 130048   ;;  %s1287_s14 = smov [#allocation13]  }
  0x4e   :  { %944 = vmatpush3.bf16.msra.mxu0 %v1051_v1  ;;  %v1055_v5 = vld [vmem:[%s1509_s1 + $0x28] sm:$0xff]   ;;  %v1056_v6 = vld [vmem:[%s1509_s1 + $0x60] sm:$0xff]   ;;  %v1058_v8 = vld [vmem:[%s1509_s1 + $0x58] sm:$0xff]   ;;  %1002 = vmatprep.mubr.msk.bf16.mxu1 %vm1285_vm0, %v1284_v21  ;;  %s872_s15 = sshll.u32 %s1287_s14, 4  ;;  %s873_s15 = int_to_ptr.vmem [resolvable:$true] %s872_s15 }
  0x4f   :  { %945 = vmatprep.subr.bf16.mxu0 %v1052_v2  ;;  %v1057_v7 = vld [vmem:[%s1509_s1 + $0x20] sm:$0xff]   ;;  %v1059_v9 = vld [vmem:[%s1509_s1 + $0x18] sm:$0xff]   ;;  %v1060_v10 = vld [vmem:[%s1509_s1 + $0x50] sm:$0xff]   ;;  %s1244_s16 = scalar_lea.vmem %s873_s15, 64  ;;  %p1249_p3 = scmp.lt.s32.totalorder %s873_s15, %s873_s15 }
  0x50   :  { %v122_v11 = vld [vmem:[%s1508_s0] sm:$0xff]  ;;  %v1061_v12 = vld [vmem:[%s1509_s1 + $0x10] sm:$0xff]   ;;  %v1062_v14 = vld [vmem:[%s1509_s1 + $0x48] sm:$0xff]   ;;  %p1245_p2 = scmp.ne.s32.totalorder %s873_s15, %s1244_s16  ;;  %p1250_p4 = scmp.lt.s32.totalorder %s1244_s16, %s1244_s16 }
  0x51   :  { %v124_v13 = vcombine.high %v122_v11, %v122_v11  ;;  %v1063_v16 = vld [vmem:[%s1509_s1 + $0x8] sm:$0xff]   ;;  %v1064_v17 = vld [vmem:[%s1509_s1 + $0x40] sm:$0xff]   ;;  %v126_v19 = vpack.c.bf16 %v122_v11, %v122_v11  ;;  %v1067_v20 = vld [vmem:[%s1511_s3 + $0x38] sm:$0xff]  }
  0x52   :  { %946 = vmatpush3.bf16.msra.mxu0 %v1053_v3  ;;  %v1065_v18 = vld [vmem:[%s1509_s1] sm:$0xff]   ;;  %987 = vmatpush3.bf16.msra.mxu1 %v1067_v20  ;;  %v1068_v22 = vld [vmem:[%s1511_s3 + $0x30] sm:$0xff]   ;;  %v1069_v23 = vld [vmem:[%s1511_s3 + $0x28] sm:$0xff]   ;;  %p1251_p5 = por %p1250_p4, %p1249_p3 }
  0x53   :  { %947 = vmatprep.subr.bf16.mxu0 %v1054_v4  ;;  %v127_v15 = vpack.c.bf16 %v124_v13, %v124_v13  ;;  %988 = vmatprep.subr.bf16.mxu1 %v1284_v21  ;;  %v1070_v24 = vld [vmem:[%s1511_s3 + $0x20] sm:$0xff]   ;;  %v1071_v25 = vld [vmem:[%s1511_s3 + $0x18] sm:$0xff]   ;;  %v1072_v26 = vld [vmem:[%s1511_s3 + $0x10] sm:$0xff]  }
  0x54   :  { %v1073_v27 = vld [vmem:[%s1511_s3 + $0x8] sm:$0xff]   ;;  %v1074_v28 = vld [vmem:[%s1511_s3] sm:$0xff]   ;;  %v1075_v51 = vld [vmem:[%s1513_s5 + $0x18] sm:$0xff]   ;;  %p1252_p6 = pnand %p1251_p5, %p1245_p2 }
  0x55   :  { %295 = vmatprep.mubr.bf16.mxu0 %v127_v15  ;;  %v884_v30 = vld [vmem:[#allocation2] ss:$0 sm:$0xff]  ;;  %v1076_v52 = vld [vmem:[%s1513_s5 + $0x10] sm:$0xff]   ;;  %v1077_v53 = vld [vmem:[%s1513_s5 + $0x8] sm:$0xff]  }
  0x56   :  { %948 = vmatpush3.bf16.msra.mxu0 %v1055_v5  ;;  %989 = vmatpush3.bf16.msra.mxu1 %v1068_v22  ;;  %v1078_v54 = vld [vmem:[%s1513_s5] sm:$0xff]  }
  0x57   :  { %949 = vmatprep.subr.bf16.mxu0 %v1056_v6  ;;  %990 = vmatprep.subr.bf16.mxu1 %v1284_v21  ;;  %v901_v55 = vld [vmem:[#allocation5] ss:$0 sm:$0xff]  ;;  %v1079_v11 = vld [vmem:[#allocation8] sm:$0xff]   ;;  %v910_v13 = vld [vmem:[#allocation7] ss:$0 sm:$0xff] }
  0x58   :  { %v1080_v20 = vld [vmem:[#allocation10 + $0x18] sm:$0xff]   ;;  %v1081_v22 = vld [vmem:[#allocation10 + $0x10] sm:$0xff]  }
  0x5a   :  { %950 = vmatpush3.bf16.msra.mxu0 %v1057_v7  ;;  %991 = vmatpush3.bf16.msra.mxu1 %v1069_v23  ;;  %v1082_v23 = vld [vmem:[#allocation10 + $0x8] sm:$0xff]  }
  0x5b   :  { %951 = vmatprep.subr.bf16.mxu0 %v1058_v8  ;;  %992 = vmatprep.subr.bf16.mxu1 %v1284_v21 }
  0x5e   :  { %952 = vmatpush3.bf16.msra.mxu0 %v1059_v9  ;;  %993 = vmatpush3.bf16.msra.mxu1 %v1070_v24  ;;  %v1083_v24 = vld [vmem:[#allocation10] sm:$0xff]  }
  0x5f   :  { %953 = vmatprep.subr.bf16.mxu0 %v1060_v10  ;;  %994 = vmatprep.subr.bf16.mxu1 %v1284_v21 }
  0x62   :  { %954 = vmatpush3.bf16.msra.mxu0 %v1061_v12  ;;  %995 = vmatpush3.bf16.msra.mxu1 %v1071_v25  ;;  %v916_v25 = vld [vmem:[%s1516_s8] ss:$0 sm:$0xff] }
  0x63   :  { %955 = vmatprep.subr.bf16.mxu0 %v1062_v14  ;;  %996 = vmatprep.subr.bf16.mxu1 %v1284_v21 }
  0x66   :  { %956 = vmatpush3.bf16.msra.mxu0 %v1063_v16  ;;  %997 = vmatpush3.bf16.msra.mxu1 %v1072_v26 }
  0x67   :  { %957 = vmatprep.subr.bf16.mxu0 %v1064_v17  ;;  %998 = vmatprep.subr.bf16.mxu1 %v1284_v21 }
  0x6a   :  { %958 = vmatpush3.bf16.msra.mxu0 %v1065_v18  ;;  %999 = vmatpush3.bf16.msra.mxu1 %v1073_v27 }
  0x6b   :  { %1000 = vmatprep.subr.bf16.mxu1 %v1284_v21 }
  0x6d   :  { %296 = vmatmul.mubr.bf16.vlgmr.msra.gmra.mxu0 %v126_v19 }
  0x6e   :  { %1001 = vmatpush3.bf16.msra.mxu1 %v1074_v28 }
  0x6f   :  { %1006 = vmatprep.subr.bf16.mxu1 %v1284_v21 }
 0x12d   :  { %v959_v29 = vpop.f32.mrf.mxu0 }
 0x12f   :  { %v960_v31 = vpop.f32.mrf.mxu0 }
 0x130   :  { %v961_v32 = vadd.f32 %v960_v31, %v959_v29 }
 0x131   :  { %v962_v33 = vpop.f32.mrf.mxu0 }
 0x132   :  { %v298_v34 = vadd.f32 %v961_v32, %v884_v30 }
 0x133   :  { %v963_v35 = vpop.f32.mrf.mxu0 }
 0x134   :  { %v304_v36 = vand.u32 2147483647, %v298_v34  ;;  %v303_v47 = vmax.f32 %v298_v34, 0.0 }
 0x136   :  { %v305_v37 = vsub.f32 0.0, %v304_v36 }
 0x138   :  { %v306_v38 = vmul.f32 1.442695, %v305_v37 }
 0x13a   :  { %1108 = vpow2.f32 %v306_v38 }
 0x147   :  { %v1109_v39 = vpop.eup %1108 }
 0x148   :  { %v308_v40 = vadd.f32 1.0, %v1109_v39  ;;  %v311_v41 = vmul.f32 -0.5, %v1109_v39  ;;  %v314_v43 = vand.u32 2147483647, %v1109_v39 }
 0x14a   :  { %1110 = vlog2.f32 %v308_v40  ;;  %v312_v42 = vadd.f32 1.0, %v311_v41  ;;  %vm315_vm1 = vcmp.lt.f32.partialorder %v314_v43, 0.0004427343 }
 0x14c   :  { %v313_v46 = vmul.f32 %v1109_v39, %v312_v42 }
 0x157   :  { %v1111_v44 = vpop.eup %1110 }
 0x158   :  { %v310_v45 = vmul.f32 0.6931472, %v1111_v44 }
 0x15a   :  { %v316_v48 = vsel %vm315_vm1, %v313_v46, %v310_v45  ;;  %v1086_v45 = vld [vmem:[#allocation11 + $0x74] ss:$8 sps:$4 sm:$0xff]   ;;  %v1084_v46 = vld [vmem:[#allocation11 + $0x70] ss:$8 sps:$4 sm:$0xff]  }
 0x15b   :  { %v317_v49 = vadd.f32 %v316_v48, %v303_v47  ;;  %811 = vmatprep.subr.bf16.mxu0 %v1086_v45  ;;  %v1089_v47 = vld [vmem:[#allocation11 + $0x64] ss:$8 sps:$4 sm:$0xff]   ;;  %v1087_v48 = vld [vmem:[#allocation11 + $0x60] ss:$8 sps:$4 sm:$0xff]  }
 0x15c   :  { %812 = vmatpush1.bf16.msra.mxu0 %v1084_v46 }
 0x15d   :  { %v318_v50 = vpack.c.bf16 %v317_v49, %v317_v49  ;;  %813 = vmatprep.subr.bf16.mxu0 %v1089_v47  ;;  %v1092_v49 = vld [vmem:[#allocation11 + $0x54] ss:$8 sps:$4 sm:$0xff]  }
 0x15f   :  { %1003 = vmatmul.mubr.bf16.vlgmr.msra.gmra.mxu1 %v318_v50  ;;  %v1090_v50 = vld [vmem:[#allocation11 + $0x50] ss:$8 sps:$4 sm:$0xff]  }
 0x160   :  { %1014 = vmatprep.mubr.msk.bf16.mxu1 %vm1285_vm0, %v1284_v21  ;;  %1007 = vmatpush3.bf16.msra.mxu1 %v1075_v51  ;;  %v1095_v51 = vld [vmem:[#allocation11 + $0x44] ss:$8 sps:$4 sm:$0xff]  }
 0x161   :  { %1008 = vmatprep.subr.bf16.mxu1 %v1284_v21  ;;  %814 = vmatpush1.bf16.msra.mxu0 %v1087_v48 }
 0x162   :  { %815 = vmatprep.subr.bf16.mxu0 %v1092_v49 }
 0x164   :  { %1009 = vmatpush3.bf16.msra.mxu1 %v1076_v52  ;;  %v1093_v52 = vld [vmem:[#allocation11 + $0x40] ss:$8 sps:$4 sm:$0xff]  }
 0x165   :  { %1010 = vmatprep.subr.bf16.mxu1 %v1284_v21  ;;  %816 = vmatpush1.bf16.msra.mxu0 %v1090_v50 }
 0x166   :  { %817 = vmatprep.subr.bf16.mxu0 %v1095_v51 }
 0x168   :  { %1011 = vmatpush3.bf16.msra.mxu1 %v1077_v53  ;;  %v1098_v53 = vld [vmem:[#allocation11 + $0x34] ss:$8 sps:$4 sm:$0xff]  }
 0x169   :  { %1012 = vmatprep.subr.bf16.mxu1 %v1284_v21  ;;  %818 = vmatpush1.bf16.msra.mxu0 %v1093_v52 }
 0x16a   :  { %819 = vmatprep.subr.bf16.mxu0 %v1098_v53 }
 0x16c   :  { %1013 = vmatpush3.bf16.msra.mxu1 %v1078_v54  ;;  %v1096_v54 = vld [vmem:[#allocation11 + $0x30] ss:$8 sps:$4 sm:$0xff]  }
 0x16d   :  { %1018 = vmatprep.subr.bf16.mxu1 %v1284_v21  ;;  %820 = vmatpush1.bf16.msra.mxu0 %v1096_v54 }
 0x21f   :  { %v424_v56 = vpop.f32.mrf.mxu1 }
 0x220   :  { %v425_v57 = vadd.f32 %v901_v55, %v424_v56  ;;  %v1101_v55 = vld [vmem:[#allocation11 + $0x24] ss:$8 sps:$4 sm:$0xff]   ;;  %v1099_v56 = vld [vmem:[#allocation11 + $0x20] ss:$8 sps:$4 sm:$0xff]  }
 0x221   :  { %v1004_v58 = vpop.f32.mrf.mxu1  ;;  %821 = vmatprep.subr.bf16.mxu0 %v1101_v55 }
 0x222   :  { %v431_v59 = vand.u32 2147483647, %v425_v57  ;;  %v430_v8 = vmax.f32 %v425_v57, 0.0  ;;  %822 = vmatpush1.bf16.msra.mxu0 %v1099_v56  ;;  %v1104_v57 = vld [vmem:[#allocation11 + $0x14] ss:$8 sps:$4 sm:$0xff]  }
 0x223   :  { %v427_v60 = vpop.f32.mrf.mxu1  ;;  %v1102_v58 = vld [vmem:[#allocation11 + $0x10] ss:$8 sps:$4 sm:$0xff]   ;;  %823 = vmatprep.subr.bf16.mxu0 %v1104_v57 }
 0x224   :  { %v432_v61 = vsub.f32 0.0, %v431_v59  ;;  %v1107_v59 = vld [vmem:[#allocation11 + $0x4] ss:$8 sps:$4 sm:$0xff]   ;;  %v1105_v60 = vld [vmem:[#allocation11] ss:$8 sps:$4 sm:$0xff]  }
 0x225   :  { %v1005_v62 = vpop.f32.mrf.mxu1 }
 0x226   :  { %v433_v63 = vmul.f32 1.442695, %v432_v61  ;;  %824 = vmatpush1.bf16.msra.mxu0 %v1102_v58  ;;  %v1286_v61 = vmov 0   ;;  %v919_v62 = vld [vmem:[%s1518_s10] ss:$0 sm:$0xff] }
 0x227   :  { %825 = vmatprep.subr.bf16.mxu0 %v1107_v59  ;;  %843 = vmatprep.mubr.bf16.mxu0 %v1286_v61 }
 0x228   :  { %1112 = vpow2.f32 %v433_v63 }
 0x22a   :  { %826 = vmatpush1.bf16.msra.mxu0 %v1105_v60 }
 0x235   :  { %v1113_v0 = vpop.eup %1112 }
 0x236   :  { %v435_v1 = vadd.f32 1.0, %v1113_v0  ;;  %v438_v2 = vmul.f32 -0.5, %v1113_v0  ;;  %v441_v4 = vand.u32 2147483647, %v1113_v0 }
 0x238   :  { %1114 = vlog2.f32 %v435_v1  ;;  %v439_v3 = vadd.f32 1.0, %v438_v2  ;;  %vm442_vm2 = vcmp.lt.f32.partialorder %v441_v4, 0.0004427343 }
 0x23a   :  { %v440_v7 = vmul.f32 %v1113_v0, %v439_v3 }
 0x245   :  { %v1115_v5 = vpop.eup %1114 }
 0x246   :  { %v437_v6 = vmul.f32 0.6931472, %v1115_v5 }
 0x248   :  { %v443_v9 = vsel %vm442_vm2, %v440_v7, %v437_v6 }
 0x249   :  { %v444_v10 = vadd.f32 %v443_v9, %v430_v8 }
 0x24b   :  { %v445_v12 = vpack.c.bf16 %v444_v10, %v444_v10 }
 0x24d   :  { %1015 = vmatmul.mubr.msk.bf16.vlgmr.msra.gmra.mxu1 %vm485_vm3, %v445_v12 }
 0x24e   :  { %1019 = vmatpush3.bf16.msra.mxu1 %v1079_v11  ;;  %1020 = vmatprep.mubr.msk.bf16.mxu1 %vm1285_vm0, %v1284_v21 }
 0x24f   :  { %1024 = vmatprep.subr.bf16.mxu1 %v1284_v21 }
 0x30d   :  { %v523_v14 = vpop.f32.mrf.mxu1 }
 0x30e   :  { %v524_v15 = vadd.f32 %v910_v13, %v523_v14 }
 0x30f   :  { %v1016_v16 = vpop.f32.mrf.mxu1 }
 0x310   :  { %v529_v17 = vpack.c.bf16 %v524_v15, %v524_v15 }
 0x311   :  { %v526_v18 = vpop.f32.mrf.mxu1 }
 0x312   :  { %1021 = vmatmul.mubr.msk.bf16.vlgmr.msra.gmra.mxu1 %vm545_vm4, %v529_v17 }
 0x313   :  { %v1017_v19 = vpop.f32.mrf.mxu1  ;;  %1032 = vmatprep.mubr.msk.bf16.mxu1 %vm1285_vm0, %v1284_v21  ;;  %1025 = vmatpush3.bf16.msra.mxu1 %v1080_v20 }
 0x314   :  { %1026 = vmatprep.subr.bf16.mxu1 %v1284_v21  ;;  %v721_v19 = vlaneseq }
 0x316   :  { %v722_v20 = vshrl.u32 %v721_v19, 7 }
 0x317   :  { %1027 = vmatpush3.bf16.msra.mxu1 %v1081_v22 }
 0x318   :  { %1028 = vmatprep.subr.bf16.mxu1 %v1284_v21  ;;  %v723_v22 = vsub.s32 0, %v722_v20 }
 0x31b   :  { %1029 = vmatpush3.bf16.msra.mxu1 %v1082_v23  ;;  %v727_v23 = vsub.s32 1, %v722_v20 }
 0x31c   :  { %1030 = vmatprep.subr.bf16.mxu1 %v1284_v21 }
 0x31f   :  { %1031 = vmatpush3.bf16.msra.mxu1 %v1083_v24  ;;  %v719_v24 = vld [vmem:[%s1520_s12] sm:$0x3] }
 0x3d2   :  { %v583_v26 = vpop.f32.mrf.mxu1 }
 0x3d3   :  { %v584_v27 = vadd.f32 %v916_v25, %v583_v26  ;;  %v724_v25 = vrot.slane %v719_v24, %v723_v22  ;;  %v728_v26 = vrot.slane %v719_v24, %v727_v23 }
 0x3d4   :  { %v1022_v28 = vpop.f32.mrf.mxu1 }
 0x3d5   :  { %v590_v29 = vand.u32 2147483647, %v584_v27  ;;  %v589_v41 = vmax.f32 %v584_v27, 0.0 }
 0x3d6   :  { %v586_v30 = vpop.f32.mrf.mxu1 }
 0x3d7   :  { %v591_v31 = vsub.f32 0.0, %v590_v29 }
 0x3d8   :  { %v1023_v32 = vpop.f32.mrf.mxu1 }
 0x3d9   :  { %v592_v33 = vmul.f32 1.442695, %v591_v31 }
 0x3db   :  { %1116 = vpow2.f32 %v592_v33 }
 0x3e8   :  { %v1117_v34 = vpop.eup %1116 }
 0x3e9   :  { %v594_v35 = vadd.f32 1.0, %v1117_v34  ;;  %v597_v36 = vmul.f32 -0.5, %v1117_v34  ;;  %v600_v37 = vand.u32 2147483647, %v1117_v34 }
 0x3eb   :  { %1118 = vlog2.f32 %v594_v35  ;;  %v598_v21 = vadd.f32 1.0, %v597_v36  ;;  %vm601_vm5 = vcmp.lt.f32.partialorder %v600_v37, 0.0004427343 }
 0x3ed   :  { %v599_v40 = vmul.f32 %v1117_v34, %v598_v21 }
 0x3f8   :  { %v1119_v38 = vpop.eup %1118 }
 0x3f9   :  { %v596_v39 = vmul.f32 0.6931472, %v1119_v38 }
 0x3fb   :  { %v602_v42 = vsel %vm601_vm5, %v599_v40, %v596_v39 }
 0x3fc   :  { %v603_v43 = vadd.f32 %v602_v42, %v589_v41 }
 0x3fe   :  { %v604_v44 = vpack.c.bf16 %v603_v43, %v603_v43 }
 0x400   :  { %1033 = vmatmul.mubr.msk.bf16.vlgmr.msra.gmra.mxu1 %vm485_vm3, %v604_v44 }
 0x4c0   :  { %v681_v63 = vpop.f32.mrf.mxu1 }
 0x4c1   :  { %v682_v0 = vadd.f32 %v919_v62, %v681_v63 }
 0x4c2   :  { %v1034_v1 = vpop.f32.mrf.mxu1 }
 0x4c3   :  { %v688_v2 = vand.u32 2147483647, %v682_v0  ;;  %v687_v15 = vmax.f32 %v682_v0, 0.0 }
 0x4c4   :  { %v684_v3 = vpop.f32.mrf.mxu1 }
 0x4c5   :  { %v689_v4 = vsub.f32 0.0, %v688_v2 }
 0x4c6   :  { %v1035_v5 = vpop.f32.mrf.mxu1 }
 0x4c7   :  { %v690_v6 = vmul.f32 1.442695, %v689_v4 }
 0x4c9   :  { %1120 = vpow2.f32 %v690_v6 }
 0x4d6   :  { %v1121_v7 = vpop.eup %1120 }
 0x4d7   :  { %v692_v8 = vadd.f32 1.0, %v1121_v7  ;;  %v695_v9 = vmul.f32 -0.5, %v1121_v7  ;;  %v698_v11 = vand.u32 2147483647, %v1121_v7 }
 0x4d9   :  { %1122 = vlog2.f32 %v692_v8  ;;  %v696_v10 = vadd.f32 1.0, %v695_v9  ;;  %vm699_vm6 = vcmp.lt.f32.partialorder %v698_v11, 0.0004427343 }
 0x4db   :  { %v697_v14 = vmul.f32 %v1121_v7, %v696_v10 }
 0x4e6   :  { %v1123_v12 = vpop.eup %1122 }
 0x4e7   :  { %v694_v13 = vmul.f32 0.6931472, %v1123_v12 }
 0x4e9   :  { %v700_v16 = vsel %vm699_vm6, %v697_v14, %v694_v13 }
 0x4ea   :  { %v701_v17 = vadd.f32 %v700_v16, %v687_v15 }
 0x4ec   :  { %v702_v18 = vpack.c.bf16 %v701_v17, %v701_v17 }
 0x4ee   :  { %844 = vmatmul.mubr.bf16.vlgmr.msra.gmra.mxu0 %v702_v18 }
 0x5ae   :  { %v845_v27 = vpop.f32.mrf.mxu0 }
 0x5af   :  { %v846_v29 = vadd.f32 %v845_v27, %v724_v25 }
 0x5b0   :  { %v847_v28 = vpop.f32.mrf.mxu0 }
 0x5b1   :  { %v848_v30 = vadd.f32 %v847_v28, %v728_v26 }
 0x5b2   :  { %v849_v31 = vpop.f32.mrf.mxu0 }
 0x5b3   :  { %v941_v32 = vpack.c.bf16 %v848_v30, %v846_v29 }
 0x5b4   :  { %v850_v33 = vpop.f32.mrf.mxu0 }
 0x5b5   :  { %942 = vst.sshfl [vmem:[#allocation13] sm:$0x33 pattern:$0x76325410] %v941_v32 }
 0x5b6   :  { %1255 = shalt.err (!%p1252_p6)
}
 0x5b7   :  { %875 = dma.vmem_to_hbm [thread:$0]  %s873_s15, 64, %s1521_s13, [#allocation4]  }
 0x5b8   :  { %1272 = dma.done.wait [#allocation4], 64  }
 0x5b9   :  { %1273 = vsyncadd [#allocation4], 4294967232 }
 0x5ba   :  { %879 = vsyncpa [#allocation3], 1 }
 0x5bb   :  { %880 = vsyncpa [#allocation6], 1 }
 0x5bc   :  { %881 = vsyncpa [#allocation9], 1 }
 0x5bd   :  { %882 = vsyncpa [#allocation12], 1 }
 0x5be   :  { %883 = vsyncpa [#allocation4], 1 }

</bundles_post_ra>
